<compile_context>
chip_gen: v7x
topology: tpu7x:2x2x1
jax: 0.10.0
libtpu: 0.0.40
codegen_flags: <defaults>
</compile_context>

<pallas_src>
import functools

import jax
import jax.numpy as jnp
from jax.experimental import pallas as pl
from jax.experimental.pallas import tpu as pltpu


def _round_up(x, m):
    return ((x + m - 1) // m) * m


# --------------------------------------------------------------------------
# One-shot kernel: Wn = l2_normalize(relu(W), dim=0), eps = 1e-12
# --------------------------------------------------------------------------
def _normalize_w_kernel(w_ref, wn_ref):
    w = jnp.maximum(w_ref[...], 0.0)                       # ReLU(W)
    sumsq = jnp.sum(w * w, axis=0, keepdims=True)          # (1, N_COMP)
    # max(sqrt(s), eps) == sqrt(max(s, eps^2)); rsqrt runs on the (idle) EUP.
    inv = jax.lax.rsqrt(jnp.maximum(sumsq, 1e-24))
    wn_ref[...] = (w * inv).astype(wn_ref.dtype)


def _normalize_w(W):
    FREQ, N_COMP = W.shape
    return pl.pallas_call(
        _normalize_w_kernel,
        out_shape=jax.ShapeDtypeStruct((FREQ, N_COMP), jnp.float32),
    )(W)


# --------------------------------------------------------------------------
# Streaming batched matmul kernel: out = relu(Wn @ inp[b])
# --------------------------------------------------------------------------
def _nmf_matmul_kernel(wn_ref, h_ref, out_ref):
    # wn_ref : (FREQ, N_COMP)   -- resident (constant index_map)
    # h_ref  : (N_COMP, tT)     -- current (batch, time-tile) block
    # out_ref: (FREQ, tT)
    out = jnp.dot(wn_ref[...], h_ref[...], preferred_element_type=jnp.float32)
    out_ref[...] = jnp.maximum(out, 0.0).astype(out_ref.dtype)


def _pick_tile_t(T, max_tile_t):
    if T <= max_tile_t:
        return T                                  # full extent — always legal
    return max(128, (max_tile_t // 128) * 128)    # lane-dense multiple of 128


@functools.partial(jax.jit, static_argnames=("max_tile_t",))
def nmf_d_forward(W, inp, *, max_tile_t=2048):
    """W: (FREQ, N_COMP) f32, inp: (B, N_COMP, T) f32 -> (B, FREQ, T) f32.

    max_tile_t=2048 is safe on v5e/v6e/v7x VMEM; raise to 4096+ on v6e if
    desired (diminishing returns past ~1024 on the HBM roofline).
    """
    FREQ, N_COMP = W.shape
    B, N_COMP2, T = inp.shape
    assert N_COMP == N_COMP2

    # Normalize W once (not once-per-grid-step).
    Wn = _normalize_w(W)

    tT = _pick_tile_t(T, max_tile_t)
    num_t_tiles = pl.cdiv(T, tT)

    # Explicit VMEM budget: double-buffered in/out tiles + 2x W + slack.
    bytes_in_tile = _round_up(N_COMP, 8) * _round_up(tT, 128) * 4
    bytes_out_tile = _round_up(FREQ, 8) * _round_up(tT, 128) * 4
    bytes_w = _round_up(FREQ, 8) * _round_up(N_COMP, 128) * 4
    vmem_est = 2 * (bytes_in_tile + bytes_out_tile) + 2 * bytes_w
    vmem_limit = min(max(vmem_est + (4 << 20), 16 << 20), 40 << 20)

    # Advisory cost: tiny FLOPs, dominated by streamed HBM bytes.
    cost = pl.CostEstimate(
        flops=2 * B * FREQ * N_COMP * T,
        transcendentals=0,
        bytes_accessed=4 * (B * N_COMP * T + B * FREQ * T + FREQ * N_COMP),
    )

    return pl.pallas_call(
        _nmf_matmul_kernel,
        out_shape=jax.ShapeDtypeStruct((B, FREQ, T), jnp.float32),
        grid_spec=pltpu.PrefetchScalarGridSpec(
            num_scalar_prefetch=0,
            grid=(B, num_t_tiles),
            in_specs=[
                # Wn: same block every step -> DMA'd once, stays resident.
                pl.BlockSpec((FREQ, N_COMP), lambda b, t: (0, 0)),
                # inp: one (batch, time-tile) block; leading dim squeezed.
                pl.BlockSpec((pl.Squeezed(), N_COMP, tT),
                             lambda b, t: (b, 0, t)),
            ],
            out_specs=pl.BlockSpec((pl.Squeezed(), FREQ, tT),
                                   lambda b, t: (b, 0, t)),
        ),
        compiler_params=pltpu.CompilerParams(
            dimension_semantics=("parallel", "parallel"),
            vmem_limit_bytes=vmem_limit,
        ),
        cost_estimate=cost,
    )(Wn, inp)


# --------------------------------------------------------------------------
# Pure-JAX reference (matches the PyTorch module)
# --------------------------------------------------------------------------
def nmf_d_reference(W, inp):
    w = jnp.maximum(W, 0.0)
    norm = jnp.sqrt(jnp.sum(w * w, axis=0, keepdims=True))
    w = w / jnp.maximum(norm, 1e-12)
    out = jnp.einsum("fc,bct->bft", w, inp)
    return jnp.maximum(out, 0.0)


if __name__ == "__main__":
    # Module-default component/frequency sizes (FREQ=513, N_COMP=30), small B/T.
    B, FREQ, N_COMP, T = 2, 513, 30, 384

    key = jax.random.PRNGKey(0)
    k_w, k_x = jax.random.split(key)
    W = jax.random.uniform(k_w, (FREQ, N_COMP), dtype=jnp.float32)    # torch.rand
    inp = jax.random.uniform(k_x, (B, N_COMP, T), dtype=jnp.float32)

    ref = nmf_d_reference(W, inp)

    # Default path: T <= max_tile_t -> single full-extent time tile per batch.
    out = jax.block_until_ready(nmf_d_forward(W, inp))
    assert out.shape == (B, FREQ, T)
    assert jnp.allclose(out, ref, atol=1e-5, rtol=1e-5), "mismatch (default)"

    # Exercise the T-tiled path (384 / 128 = 3 tiles per batch element).
    out1 = jax.block_until_ready(nmf_d_forward(W, inp, max_tile_t=128))
    assert jnp.allclose(out1, ref, atol=1e-5, rtol=1e-5), "mismatch (tT=128)"

    # Exercise a non-dividing tile (tT=256 -> last tile partial, masked store).
    out2 = jax.block_until_ready(nmf_d_forward(W, inp, max_tile_t=256))
    assert jnp.allclose(out2, ref, atol=1e-5, rtol=1e-5), "mismatch (tT=256)"

    print("KERNEL_OK")
</pallas_src>

<mosaic_0001>
module attributes {stable_mosaic.version = 11 : i64} {
  func.func @_nmf_matmul_kernel(%arg0: i32, %arg1: i32, %arg2: memref<513x30xf32, #tpu.memory_space<vmem>>, %arg3: memref<1x30x384xf32, #tpu.memory_space<vmem>>, %arg4: memref<1x513x384xf32, #tpu.memory_space<vmem>>) attributes {dimension_semantics = [#tpu.dimension_semantics<parallel>, #tpu.dimension_semantics<parallel>], iteration_bounds = array<i64: 2, 1>, scalar_prefetch = 0 : i64, scratch_operands = 0 : i64, tpu.core_type = #tpu.core_type<tc>, window_params = [{pipeline_mode = #tpu.pipeline_mode<synchronous>, transform_indices = @transform_0, window_bounds = array<i64: 513, 30>}, {transform_indices = @transform_1, window_bounds = array<i64: 1, 30, 384>}, {transform_indices = @transform_2, window_bounds = array<i64: 1, 513, 384>}]} {
    %c0 = arith.constant 0 : index
    %c0_0 = arith.constant 0 : index
    %0 = vector.load %arg2[%c0, %c0_0] : memref<513x30xf32, #tpu.memory_space<vmem>>, vector<513x30xf32>
    %c0_1 = arith.constant 0 : index
    %c0_2 = arith.constant 0 : index
    %c0_3 = arith.constant 0 : index
    %1 = vector.load %arg3[%c0_1, %c0_2, %c0_3] : memref<1x30x384xf32, #tpu.memory_space<vmem>>, vector<1x30x384xf32>
    %2 = vector.shape_cast %1 : vector<1x30x384xf32> to vector<30x384xf32>
    %cst = arith.constant dense<0.000000e+00> : vector<513x384xf32>
    %3 = tpu.matmul %0, %2, %cst {dimension_numbers = #tpu.dot_dimension_numbers<[1], [0], [0], [1], [0, 0, 1, 1], [], []>} : vector<513x30xf32>, vector<30x384xf32>, vector<513x384xf32> -> vector<513x384xf32>
    %cst_4 = arith.constant 0.000000e+00 : f32
    %4 = vector.broadcast %cst_4 : f32 to vector<513x384xf32>
    %5 = arith.maximumf %3, %4 : vector<513x384xf32>
    %c0_5 = arith.constant 0 : index
    %c0_6 = arith.constant 0 : index
    %c0_7 = arith.constant 0 : index
    %6 = vector.load %arg4[%c0_5, %c0_6, %c0_7] : memref<1x513x384xf32, #tpu.memory_space<vmem>>, vector<1x513x384xf32>
    %7 = vector.shape_cast %6 : vector<1x513x384xf32> to vector<513x384xf32>
    %8 = vector.shape_cast %5 : vector<513x384xf32> to vector<1x513x384xf32>
    tpu.vector_store %arg4[%c0_5, %c0_6, %c0_7], %8 {strides = array<i32>} : memref<1x513x384xf32, #tpu.memory_space<vmem>>, vector<1x513x384xf32>,
    return
  }
  func.func @transform_0(%arg0: i32, %arg1: i32) -> (i32, i32) {
    %c0_i32 = arith.constant 0 : i32
    %c0_i32_0 = arith.constant 0 : i32
    %c0_i32_1 = arith.constant 0 : i32
    return %c0_i32, %c0_i32_0 : i32, i32
  }
  func.func @transform_1(%arg0: i32, %arg1: i32) -> (i32, i32, i32) {
    %c0_i32 = arith.constant 0 : i32
    %c0_i32_0 = arith.constant 0 : i32
    return %arg0, %c0_i32, %arg1 : i32, i32, i32
  }
  func.func @transform_2(%arg0: i32, %arg1: i32) -> (i32, i32, i32) {
    %c0_i32 = arith.constant 0 : i32
    %c0_i32_0 = arith.constant 0 : i32
    return %arg0, %c0_i32, %arg1 : i32, i32, i32
  }
}

module attributes {stable_mosaic.version = 11 : i64} {
  func.func @_normalize_w_kernel(%arg0: memref<513x30xf32, #tpu.memory_space<vmem>>, %arg1: memref<513x30xf32, #tpu.memory_space<vmem>>) attributes {dimension_semantics = [], scalar_prefetch = 0 : i64, scratch_operands = 0 : i64, tpu.core_type = #tpu.core_type<tc>} {
    %c0 = arith.constant 0 : index
    %c0_0 = arith.constant 0 : index
    %0 = vector.load %arg0[%c0, %c0_0] : memref<513x30xf32, #tpu.memory_space<vmem>>, vector<513x30xf32>
    %cst = arith.constant 0.000000e+00 : f32
    %1 = vector.broadcast %cst : f32 to vector<513x30xf32>
    %2 = arith.maximumf %0, %1 : vector<513x30xf32>
    %3 = arith.mulf %2, %2 : vector<513x30xf32>
    %cst_1 = arith.constant dense<0.000000e+00> : vector<30xf32>
    %4 = vector.multi_reduction <add>, %3, %cst_1 [0] : vector<513x30xf32> to vector<30xf32>
    %5 = vector.shape_cast %4 : vector<30xf32> to vector<1x30xf32>
    %cst_2 = arith.constant 1.000000e-24 : f32
    %6 = vector.broadcast %cst_2 : f32 to vector<1x30xf32>
    %7 = arith.maximumf %5, %6 : vector<1x30xf32>
    %8 = math.rsqrt %7 : vector<1x30xf32>
    %9 = vector.broadcast %8 : vector<1x30xf32> to vector<513x30xf32>
    %10 = arith.mulf %2, %9 : vector<513x30xf32>
    %c0_3 = arith.constant 0 : index
    %c0_4 = arith.constant 0 : index
    %11 = vector.load %arg1[%c0_3, %c0_4] : memref<513x30xf32, #tpu.memory_space<vmem>>, vector<513x30xf32>
    tpu.vector_store %arg1[%c0_3, %c0_4], %10 {strides = array<i32>} : memref<513x30xf32, #tpu.memory_space<vmem>>, vector<513x30xf32>,
    return
  }
}

</mosaic_0001>

<bundles_post_ra>
// kernel: nmf_d_forward.2
= control target key start
LH: loop header
LB: loop body
LE: loop exit
PB: predicated region body
PF: predicated region fallthrough
CT: control target
= control target key end

     0   :  { %vm203_vm0 = vcmask 244736   ;;  %vm331_vm1 = vcmask 237568   ;;  %s1400_s0 = inlined_call_operand.vmem [shape: f32[513,30], index: 0, kind: input, shape index: {}]   ;;  %s1401_s1 = inlined_call_operand.vmem [shape: f32[513,30], index: 1, kind: output, shape index: {}]  }
   0x1   :  { %v8_v0 = vld [vmem:[%s1400_s0] sm:$0xff]  ;;  %v9_v1 = vld [vmem:[%s1400_s0 + $0x8] sm:$0xff]  ;;  %v10_v2 = vld [vmem:[%s1400_s0 + $0x10] sm:$0xff] }
   0x2   :  { %v11_v3 = vld [vmem:[%s1400_s0 + $0x18] sm:$0xff]  ;;  %v500_v4 = vmax.f32 %v8_v0, 0.0  ;;  %v502_v5 = vmax.f32 %v9_v1, 0.0  ;;  %v504_v6 = vmax.f32 %v10_v2, 0.0  ;;  %v12_v7 = vld [vmem:[%s1400_s0 + $0x20] sm:$0xff]  ;;  %v13_v9 = vld [vmem:[%s1400_s0 + $0x28] sm:$0xff] }
   0x3   :  { %v509_v8 = vmax.f32 %v11_v3, 0.0  ;;  %v14_v10 = vld [vmem:[%s1400_s0 + $0x30] sm:$0xff]  ;;  %v517_v11 = vmax.f32 %v12_v7, 0.0  ;;  %v525_v15 = vmax.f32 %v13_v9, 0.0  ;;  %v15_v17 = vld [vmem:[%s1400_s0 + $0x38] sm:$0xff]  ;;  %v16_v23 = vld [vmem:[%s1400_s0 + $0x40] sm:$0xff] }
   0x4   :  { %v138_v12 = vmul.f32 %v500_v4, %v500_v4  ;;  %v139_v13 = vmul.f32 %v502_v5, %v502_v5  ;;  %v140_v14 = vmul.f32 %v504_v6, %v504_v6  ;;  %v532_v18 = vmax.f32 %v14_v10, 0.0  ;;  %v17_v28 = vld [vmem:[%s1400_s0 + $0x48] sm:$0xff]  ;;  %v18_v33 = vld [vmem:[%s1400_s0 + $0x50] sm:$0xff]  ;;  %v19_v38 = vld [vmem:[%s1400_s0 + $0x58] sm:$0xff] }
   0x5   :  { %v141_v16 = vmul.f32 %v509_v8, %v509_v8  ;;  %v142_v19 = vmul.f32 %v517_v11, %v517_v11  ;;  %v542_v25 = vmax.f32 %v15_v17, 0.0  ;;  %v143_v26 = vmul.f32 %v525_v15, %v525_v15  ;;  %v20_v43 = vld [vmem:[%s1400_s0 + $0x60] sm:$0xff]  ;;  %v21_v48 = vld [vmem:[%s1400_s0 + $0x68] sm:$0xff]  ;;  %v22_v53 = vld [vmem:[%s1400_s0 + $0x70] sm:$0xff] }
   0x6   :  { %v204_v20 = vsel %vm203_vm0, %v138_v12, 0.0  ;;  %v205_v21 = vsel %vm203_vm0, %v139_v13, 0.0  ;;  %v207_v22 = vsel %vm203_vm0, %v140_v14, 0.0  ;;  %v550_v30 = vmax.f32 %v16_v23, 0.0  ;;  %v23_v58 = vld [vmem:[%s1400_s0 + $0x78] sm:$0xff]  ;;  %v24_v63 = vld [vmem:[%s1400_s0 + $0x80] sm:$0xff] }
   0x7   :  { %v206_v24 = vadd.f32 %v205_v21, %v204_v20  ;;  %v209_v27 = vsel %vm203_vm0, %v141_v16, 0.0  ;;  %v144_v31 = vmul.f32 %v532_v18, %v532_v18  ;;  %v211_v32 = vsel %vm203_vm0, %v142_v19, 0.0  ;;  %v25_v7 = vld [vmem:[%s1400_s0 + $0x88] sm:$0xff]  ;;  %v26_v14 = vld [vmem:[%s1400_s0 + $0x90] sm:$0xff]  ;;  %v27_v21 = vld [vmem:[%s1400_s0 + $0x98] sm:$0xff] }
   0x8   :  { %v558_v35 = vmax.f32 %v17_v28, 0.0  ;;  %v145_v36 = vmul.f32 %v542_v25, %v542_v25  ;;  %v213_v37 = vsel %vm203_vm0, %v143_v26, 0.0  ;;  %v566_v40 = vmax.f32 %v18_v33, 0.0  ;;  %v29_v33 = vld [vmem:[%s1400_s0 + $0xa8] sm:$0xff] }
   0x9   :  { %v208_v29 = vadd.f32 %v207_v22, %v206_v24  ;;  %v146_v41 = vmul.f32 %v550_v30, %v550_v30  ;;  %v215_v42 = vsel %vm203_vm0, %v144_v31, 0.0  ;;  %v574_v45 = vmax.f32 %v19_v38, 0.0 }
   0xa   :  { %v147_v46 = vmul.f32 %v558_v35, %v558_v35  ;;  %v217_v47 = vsel %vm203_vm0, %v145_v36, 0.0  ;;  %v582_v50 = vmax.f32 %v20_v43, 0.0  ;;  %v148_v51 = vmul.f32 %v566_v40, %v566_v40 }
   0xb   :  { %v210_v34 = vadd.f32 %v209_v27, %v208_v29  ;;  %v219_v52 = vsel %vm203_vm0, %v146_v41, 0.0  ;;  %v590_v55 = vmax.f32 %v21_v48, 0.0  ;;  %v149_v56 = vmul.f32 %v574_v45, %v574_v45  ;;  %v28_v27 = vld [vmem:[%s1400_s0 + $0xa0] sm:$0xff] }
   0xc   :  { %v221_v57 = vsel %vm203_vm0, %v147_v46, 0.0  ;;  %v598_v60 = vmax.f32 %v22_v53, 0.0  ;;  %v150_v61 = vmul.f32 %v582_v50, %v582_v50  ;;  %v223_v62 = vsel %vm203_vm0, %v148_v51, 0.0  ;;  %v31_v46 = vld [vmem:[%s1400_s0 + $0xb8] sm:$0xff] }
   0xd   :  { %v212_v39 = vadd.f32 %v211_v32, %v210_v34  ;;  %v606_v1 = vmax.f32 %v23_v58, 0.0  ;;  %v151_v2 = vmul.f32 %v590_v55, %v590_v55  ;;  %v225_v3 = vsel %vm203_vm0, %v149_v56, 0.0  ;;  %v33_v58 = vld [vmem:[%s1400_s0 + $0xc8] sm:$0xff] }
   0xe   :  { %v614_v10 = vmax.f32 %v24_v63, 0.0  ;;  %v152_v12 = vmul.f32 %v598_v60, %v598_v60  ;;  %v227_v13 = vsel %vm203_vm0, %v150_v61, 0.0  ;;  %v622_v17 = vmax.f32 %v25_v7, 0.0 }
   0xf   :  { %v214_v44 = vadd.f32 %v213_v37, %v212_v39  ;;  %v153_v19 = vmul.f32 %v606_v1, %v606_v1  ;;  %v229_v20 = vsel %vm203_vm0, %v151_v2, 0.0  ;;  %v630_v23 = vmax.f32 %v26_v14, 0.0  ;;  %v30_v39 = vld [vmem:[%s1400_s0 + $0xb0] sm:$0xff] }
  0x10   :  { %v154_v24 = vmul.f32 %v614_v10, %v614_v10  ;;  %v231_v26 = vsel %vm203_vm0, %v152_v12, 0.0  ;;  %v638_v29 = vmax.f32 %v27_v21, 0.0  ;;  %v155_v31 = vmul.f32 %v622_v17, %v622_v17  ;;  %v35_v12 = vld [vmem:[%s1400_s0 + $0xd8] sm:$0xff] }
  0x11   :  { %v216_v49 = vadd.f32 %v215_v42, %v214_v44  ;;  %v233_v32 = vsel %vm203_vm0, %v153_v19, 0.0  ;;  %v646_v36 = vmax.f32 %v28_v27, 0.0  ;;  %v156_v37 = vmul.f32 %v630_v23, %v630_v23  ;;  %v37_v27 = vld [vmem:[%s1400_s0 + $0xe8] sm:$0xff] }
  0x12   :  { %v235_v38 = vsel %vm203_vm0, %v154_v24, 0.0  ;;  %v654_v42 = vmax.f32 %v29_v33, 0.0  ;;  %v157_v43 = vmul.f32 %v638_v29, %v638_v29  ;;  %v237_v44 = vsel %vm203_vm0, %v155_v31, 0.0 }
  0x13   :  { %v218_v54 = vadd.f32 %v217_v47, %v216_v49  ;;  %v662_v48 = vmax.f32 %v30_v39, 0.0  ;;  %v158_v49 = vmul.f32 %v646_v36, %v646_v36  ;;  %v239_v51 = vsel %vm203_vm0, %v156_v37, 0.0 }
  0x14   :  { %v159_v56 = vmul.f32 %v654_v42, %v654_v42 }
  0x15   :  { %v220_v59 = vadd.f32 %v219_v52, %v218_v54  ;;  %v32_v52 = vld [vmem:[%s1400_s0 + $0xc0] sm:$0xff]  ;;  %v670_v54 = vmax.f32 %v31_v46, 0.0  ;;  %v243_v63 = vsel %vm203_vm0, %v158_v49, 0.0 }
  0x16   :  { %v678_v61 = vmax.f32 %v32_v52, 0.0 }
  0x17   :  { %v222_v0 = vadd.f32 %v221_v57, %v220_v59  ;;  %v241_v57 = vsel %vm203_vm0, %v157_v43, 0.0  ;;  %v161_v7 = vmul.f32 %v670_v54, %v670_v54  ;;  %v39_v43 = vld [vmem:[%s1400_s0 + $0xf8] sm:$0xff] }
  0x19   :  { %v224_v9 = vadd.f32 %v223_v62, %v222_v0  ;;  %v160_v62 = vmul.f32 %v662_v48, %v662_v48  ;;  %v34_v0 = vld [vmem:[%s1400_s0 + $0xd0] sm:$0xff] }
  0x1a   :  { %v694_v14 = vmax.f32 %v34_v0, 0.0 }
  0x1b   :  { %v226_v16 = vadd.f32 %v225_v3, %v224_v9  ;;  %v686_v3 = vmax.f32 %v33_v58, 0.0  ;;  %v245_v9 = vsel %vm203_vm0, %v159_v56, 0.0  ;;  %v247_v19 = vsel %vm203_vm0, %v160_v62, 0.0  ;;  %v41_v58 = vld [vmem:[%s1400_s0 + $0x108] sm:$0xff] }
  0x1d   :  { %v228_v22 = vadd.f32 %v227_v13, %v226_v16  ;;  %v162_v16 = vmul.f32 %v678_v61, %v678_v61  ;;  %v163_v24 = vmul.f32 %v686_v3, %v686_v3 }
  0x1f   :  { %v230_v28 = vadd.f32 %v229_v20, %v228_v22  ;;  %v36_v20 = vld [vmem:[%s1400_s0 + $0xe0] sm:$0xff]  ;;  %v702_v22 = vmax.f32 %v35_v12, 0.0  ;;  %v251_v33 = vsel %vm203_vm0, %v162_v16, 0.0  ;;  %v43_v16 = vld [vmem:[%s1400_s0 + $0x118] sm:$0xff] }
  0x20   :  { %v710_v31 = vmax.f32 %v36_v20, 0.0 }
  0x21   :  { %v232_v34 = vadd.f32 %v231_v26, %v230_v28  ;;  %v249_v26 = vsel %vm203_vm0, %v161_v7, 0.0  ;;  %v165_v39 = vmul.f32 %v702_v22, %v702_v22 }
  0x23   :  { %v234_v41 = vadd.f32 %v233_v32, %v232_v34  ;;  %v164_v32 = vmul.f32 %v694_v14, %v694_v14  ;;  %v38_v34 = vld [vmem:[%s1400_s0 + $0xf0] sm:$0xff] }
  0x24   :  { %v726_v46 = vmax.f32 %v38_v34, 0.0  ;;  %v45_v34 = vld [vmem:[%s1400_s0 + $0x128] sm:$0xff] }
  0x25   :  { %v236_v47 = vadd.f32 %v235_v38, %v234_v41  ;;  %v718_v38 = vmax.f32 %v37_v27, 0.0  ;;  %v253_v41 = vsel %vm203_vm0, %v163_v24, 0.0  ;;  %v255_v49 = vsel %vm203_vm0, %v164_v32, 0.0 }
  0x27   :  { %v238_v53 = vadd.f32 %v237_v44, %v236_v47  ;;  %v166_v47 = vmul.f32 %v710_v31, %v710_v31  ;;  %v167_v56 = vmul.f32 %v718_v38, %v718_v38 }
  0x29   :  { %v240_v59 = vadd.f32 %v239_v51, %v238_v53  ;;  %v40_v51 = vld [vmem:[%s1400_s0 + $0x100] sm:$0xff]  ;;  %v734_v53 = vmax.f32 %v39_v43, 0.0  ;;  %v259_v0 = vsel %vm203_vm0, %v166_v47, 0.0 }
  0x2a   :  { %v742_v62 = vmax.f32 %v40_v51, 0.0 }
  0x2b   :  { %v242_v2 = vadd.f32 %v241_v57, %v240_v59  ;;  %v257_v57 = vsel %vm203_vm0, %v165_v39, 0.0  ;;  %v169_v12 = vmul.f32 %v734_v53, %v734_v53 }
  0x2d   :  { %v244_v13 = vadd.f32 %v243_v63, %v242_v2  ;;  %v168_v63 = vmul.f32 %v726_v46, %v726_v46  ;;  %v42_v2 = vld [vmem:[%s1400_s0 + $0x110] sm:$0xff] }
  0x2e   :  { %v758_v20 = vmax.f32 %v42_v2, 0.0 }
  0x2f   :  { %v246_v21 = vadd.f32 %v245_v9, %v244_v13  ;;  %v750_v9 = vmax.f32 %v41_v58, 0.0  ;;  %v261_v13 = vsel %vm203_vm0, %v167_v56, 0.0  ;;  %v263_v24 = vsel %vm203_vm0, %v168_v63, 0.0  ;;  %v47_v56 = vld [vmem:[%s1400_s0 + $0x138] sm:$0xff] }
  0x31   :  { %v248_v28 = vadd.f32 %v247_v19, %v246_v21  ;;  %v170_v21 = vmul.f32 %v742_v62, %v742_v62  ;;  %v171_v32 = vmul.f32 %v750_v9, %v750_v9 }
  0x33   :  { %v250_v37 = vadd.f32 %v249_v26, %v248_v28  ;;  %v44_v26 = vld [vmem:[%s1400_s0 + $0x120] sm:$0xff]  ;;  %v766_v28 = vmax.f32 %v43_v16, 0.0  ;;  %v267_v43 = vsel %vm203_vm0, %v170_v21, 0.0  ;;  %v49_v16 = vld [vmem:[%s1400_s0 + $0x148] sm:$0xff] }
  0x34   :  { %v774_v39 = vmax.f32 %v44_v26, 0.0 }
  0x35   :  { %v252_v44 = vadd.f32 %v251_v33, %v250_v37  ;;  %v265_v33 = vsel %vm203_vm0, %v169_v12, 0.0  ;;  %v173_v51 = vmul.f32 %v766_v28, %v766_v28 }
  0x37   :  { %v254_v52 = vadd.f32 %v253_v41, %v252_v44  ;;  %v172_v41 = vmul.f32 %v758_v20, %v758_v20  ;;  %v46_v44 = vld [vmem:[%s1400_s0 + $0x130] sm:$0xff] }
  0x38   :  { %v790_v58 = vmax.f32 %v46_v44, 0.0 }
  0x39   :  { %v256_v59 = vadd.f32 %v255_v49, %v254_v52  ;;  %v782_v49 = vmax.f32 %v45_v34, 0.0  ;;  %v269_v52 = vsel %vm203_vm0, %v171_v32, 0.0  ;;  %v271_v63 = vsel %vm203_vm0, %v172_v41, 0.0  ;;  %v51_v41 = vld [vmem:[%s1400_s0 + $0x158] sm:$0xff] }
  0x3b   :  { %v258_v7 = vadd.f32 %v257_v57, %v256_v59  ;;  %v174_v59 = vmul.f32 %v774_v39, %v774_v39  ;;  %v175_v12 = vmul.f32 %v782_v49, %v782_v49 }
  0x3d   :  { %v260_v19 = vadd.f32 %v259_v0, %v258_v7  ;;  %v48_v0 = vld [vmem:[%s1400_s0 + $0x140] sm:$0xff]  ;;  %v798_v7 = vmax.f32 %v47_v56, 0.0  ;;  %v275_v26 = vsel %vm203_vm0, %v174_v59, 0.0 }
  0x3e   :  { %v806_v21 = vmax.f32 %v48_v0, 0.0  ;;  %v53_v0 = vld [vmem:[%s1400_s0 + $0x168] sm:$0xff] }
  0x3f   :  { %v262_v27 = vadd.f32 %v261_v13, %v260_v19  ;;  %v273_v13 = vsel %vm203_vm0, %v173_v51, 0.0  ;;  %v177_v34 = vmul.f32 %v798_v7, %v798_v7 }
  0x41   :  { %v264_v37 = vadd.f32 %v263_v24, %v262_v27  ;;  %v176_v24 = vmul.f32 %v790_v58, %v790_v58  ;;  %v50_v27 = vld [vmem:[%s1400_s0 + $0x150] sm:$0xff] }
  0x42   :  { %v822_v44 = vmax.f32 %v50_v27, 0.0 }
  0x43   :  { %v266_v47 = vadd.f32 %v265_v33, %v264_v37  ;;  %v814_v33 = vmax.f32 %v49_v16, 0.0  ;;  %v277_v37 = vsel %vm203_vm0, %v175_v12, 0.0  ;;  %v279_v51 = vsel %vm203_vm0, %v176_v24, 0.0 }
  0x45   :  { %v268_v57 = vadd.f32 %v267_v43, %v266_v47  ;;  %v178_v47 = vmul.f32 %v806_v21, %v806_v21  ;;  %v179_v59 = vmul.f32 %v814_v33, %v814_v33 }
  0x47   :  { %v270_v2 = vadd.f32 %v269_v52, %v268_v57  ;;  %v52_v52 = vld [vmem:[%s1400_s0 + $0x160] sm:$0xff]  ;;  %v830_v57 = vmax.f32 %v51_v41, 0.0  ;;  %v283_v16 = vsel %vm203_vm0, %v178_v47, 0.0 }
  0x48   :  { %v838_v12 = vmax.f32 %v52_v52, 0.0 }
  0x49   :  { %v272_v19 = vadd.f32 %v271_v63, %v270_v2  ;;  %v281_v63 = vsel %vm203_vm0, %v177_v34, 0.0  ;;  %v181_v27 = vmul.f32 %v830_v57, %v830_v57  ;;  %v55_v34 = vld [vmem:[%s1400_s0 + $0x178] sm:$0xff] }
  0x4a   :  { %1423 = vst [vmem:[#allocation2_spill] sm:$0xff] %v838_v12 }
  0x4b   :  { %v274_v32 = vadd.f32 %v273_v13, %v272_v19  ;;  %v180_v13 = vmul.f32 %v822_v44, %v822_v44  ;;  %v54_v19 = vld [vmem:[%s1400_s0 + $0x170] sm:$0xff] }
  0x4c   :  { %v854_v41 = vmax.f32 %v54_v19, 0.0 }
  0x4d   :  { %v276_v43 = vadd.f32 %v275_v26, %v274_v32  ;;  %v846_v26 = vmax.f32 %v53_v0, 0.0  ;;  %v285_v32 = vsel %vm203_vm0, %v179_v59, 0.0  ;;  %v287_v47 = vsel %vm203_vm0, %v180_v13, 0.0  ;;  %v57_v0 = vld [vmem:[%s1400_s0 + $0x188] sm:$0xff] }
  0x4e   :  { %1425 = vst [vmem:[#allocation4_spill] sm:$0xff] %v854_v41  ;;  %v184_v13 = vmul.f32 %v854_v41, %v854_v41 }
  0x4f   :  { %v278_v56 = vadd.f32 %v277_v37, %v276_v43  ;;  %1424 = vst [vmem:[#allocation3_spill] sm:$0xff] %v846_v26  ;;  %v182_v43 = vmul.f32 %v838_v12, %v838_v12  ;;  %v183_v59 = vmul.f32 %v846_v26, %v846_v26 }
  0x50   :  { %v295_v41 = vsel %vm203_vm0, %v184_v13, 0.0 }
  0x51   :  { %v280_v2 = vadd.f32 %v279_v51, %v278_v56  ;;  %v56_v51 = vld [vmem:[%s1400_s0 + $0x180] sm:$0xff]  ;;  %v862_v56 = vmax.f32 %v55_v34, 0.0  ;;  %v291_v19 = vsel %vm203_vm0, %v182_v43, 0.0  ;;  %v878_v34 = vmax.f32 %v57_v0, 0.0 }
  0x53   :  { %v282_v24 = vadd.f32 %v281_v63, %v280_v2  ;;  %1426 = vst [vmem:[#allocation5_spill] sm:$0xff] %v862_v56  ;;  %v289_v63 = vsel %vm203_vm0, %v181_v27, 0.0  ;;  %1428 = vst [vmem:[#allocation7_spill] sm:$0xff] %v878_v34  ;;  %v185_v27 = vmul.f32 %v862_v56, %v862_v56 }
  0x55   :  { %v284_v37 = vadd.f32 %v283_v16, %v282_v24  ;;  %v870_v16 = vmax.f32 %v56_v51, 0.0  ;;  %v58_v24 = vld [vmem:[%s1400_s0 + $0x190] sm:$0xff]  ;;  %v297_v56 = vsel %vm203_vm0, %v185_v27, 0.0 }
  0x57   :  { %v286_v52 = vadd.f32 %v285_v32, %v284_v37  ;;  %1427 = vst [vmem:[#allocation6_spill] sm:$0xff] %v870_v16  ;;  %v293_v37 = vsel %vm203_vm0, %v183_v59, 0.0  ;;  %v186_v43 = vmul.f32 %v870_v16, %v870_v16  ;;  %v187_v59 = vmul.f32 %v878_v34, %v878_v34 }
  0x59   :  { %v288_v2 = vadd.f32 %v287_v47, %v286_v52  ;;  %v59_v47 = vld [vmem:[%s1400_s0 + $0x198] sm:$0xff]  ;;  %v886_v52 = vmax.f32 %v58_v24, 0.0  ;;  %v299_v16 = vsel %vm203_vm0, %v186_v43, 0.0  ;;  %v301_v34 = vsel %vm203_vm0, %v187_v59, 0.0 }
  0x5b   :  { %v290_v32 = vadd.f32 %v289_v63, %v288_v2  ;;  %1429 = vst [vmem:[#allocation8_spill] sm:$0xff] %v886_v52  ;;  %v60_v63 = vld [vmem:[%s1400_s0 + $0x1a0] sm:$0xff]  ;;  %v894_v2 = vmax.f32 %v59_v47, 0.0  ;;  %v188_v13 = vmul.f32 %v886_v52, %v886_v52 }
  0x5d   :  { %v292_v51 = vadd.f32 %v291_v19, %v290_v32  ;;  %1430 = vst [vmem:[#allocation9_spill] sm:$0xff] %v894_v2  ;;  %v61_v19 = vld [vmem:[%s1400_s0 + $0x1a8] sm:$0xff]  ;;  %v902_v32 = vmax.f32 %v60_v63, 0.0  ;;  %v189_v27 = vmul.f32 %v894_v2, %v894_v2  ;;  %v303_v52 = vsel %vm203_vm0, %v188_v13, 0.0 }
  0x5f   :  { %v294_v0 = vadd.f32 %v293_v37, %v292_v51  ;;  %1431 = vst [vmem:[#allocation10_spill] sm:$0xff] %v902_v32  ;;  %v62_v37 = vld [vmem:[%s1400_s0 + $0x1b0] sm:$0xff]  ;;  %v910_v51 = vmax.f32 %v61_v19, 0.0  ;;  %v190_v43 = vmul.f32 %v902_v32, %v902_v32  ;;  %v305_v2 = vsel %vm203_vm0, %v189_v27, 0.0 }
  0x61   :  { %v296_v24 = vadd.f32 %v295_v41, %v294_v0  ;;  %1432 = vst [vmem:[#allocation11_spill] sm:$0xff] %v910_v51  ;;  %v63_v41 = vld [vmem:[%s1400_s0 + $0x1b8] sm:$0xff]  ;;  %v918_v0 = vmax.f32 %v62_v37, 0.0  ;;  %v191_v59 = vmul.f32 %v910_v51, %v910_v51  ;;  %v307_v32 = vsel %vm203_vm0, %v190_v43, 0.0 }
  0x63   :  { %v298_v47 = vadd.f32 %v297_v56, %v296_v24  ;;  %1433 = vst [vmem:[#allocation12_spill] sm:$0xff] %v918_v0  ;;  %v64_v56 = vld [vmem:[%s1400_s0 + $0x1c0] sm:$0xff]  ;;  %v926_v24 = vmax.f32 %v63_v41, 0.0  ;;  %v192_v13 = vmul.f32 %v918_v0, %v918_v0  ;;  %v309_v51 = vsel %vm203_vm0, %v191_v59, 0.0 }
  0x65   :  { %v300_v63 = vadd.f32 %v299_v16, %v298_v47  ;;  %1434 = vst [vmem:[#allocation13_spill] sm:$0xff] %v926_v24  ;;  %v65_v16 = vld [vmem:[%s1400_s0 + $0x1c8] sm:$0xff]  ;;  %v934_v47 = vmax.f32 %v64_v56, 0.0  ;;  %v193_v27 = vmul.f32 %v926_v24, %v926_v24  ;;  %v311_v0 = vsel %vm203_vm0, %v192_v13, 0.0 }
  0x67   :  { %v302_v19 = vadd.f32 %v301_v34, %v300_v63  ;;  %1435 = vst [vmem:[#allocation14_spill] sm:$0xff] %v934_v47  ;;  %v66_v34 = vld [vmem:[%s1400_s0 + $0x1d0] sm:$0xff]  ;;  %v942_v63 = vmax.f32 %v65_v16, 0.0  ;;  %v194_v43 = vmul.f32 %v934_v47, %v934_v47  ;;  %v313_v24 = vsel %vm203_vm0, %v193_v27, 0.0 }
  0x69   :  { %v304_v37 = vadd.f32 %v303_v52, %v302_v19  ;;  %1436 = vst [vmem:[#allocation15_spill] sm:$0xff] %v942_v63  ;;  %v67_v52 = vld [vmem:[%s1400_s0 + $0x1d8] sm:$0xff]  ;;  %v950_v19 = vmax.f32 %v66_v34, 0.0  ;;  %v195_v59 = vmul.f32 %v942_v63, %v942_v63  ;;  %v315_v47 = vsel %vm203_vm0, %v194_v43, 0.0 }
  0x6b   :  { %v306_v41 = vadd.f32 %v305_v2, %v304_v37  ;;  %1437 = vst [vmem:[#allocation16_spill] sm:$0xff] %v950_v19  ;;  %v68_v2 = vld [vmem:[%s1400_s0 + $0x1e0] sm:$0xff]  ;;  %v958_v37 = vmax.f32 %v67_v52, 0.0  ;;  %v196_v13 = vmul.f32 %v950_v19, %v950_v19  ;;  %v317_v63 = vsel %vm203_vm0, %v195_v59, 0.0 }
  0x6d   :  { %v308_v56 = vadd.f32 %v307_v32, %v306_v41  ;;  %1438 = vst [vmem:[#allocation17_spill] sm:$0xff] %v958_v37  ;;  %v69_v32 = vld [vmem:[%s1400_s0 + $0x1e8] sm:$0xff]  ;;  %v966_v41 = vmax.f32 %v68_v2, 0.0  ;;  %v197_v27 = vmul.f32 %v958_v37, %v958_v37  ;;  %v319_v19 = vsel %vm203_vm0, %v196_v13, 0.0 }
  0x6f   :  { %v310_v16 = vadd.f32 %v309_v51, %v308_v56  ;;  %1439 = vst [vmem:[#allocation18_spill] sm:$0xff] %v966_v41  ;;  %v70_v51 = vld [vmem:[%s1400_s0 + $0x1f0] sm:$0xff]  ;;  %v974_v56 = vmax.f32 %v69_v32, 0.0  ;;  %v198_v43 = vmul.f32 %v966_v41, %v966_v41  ;;  %v321_v37 = vsel %vm203_vm0, %v197_v27, 0.0 }
  0x71   :  { %v312_v34 = vadd.f32 %v311_v0, %v310_v16  ;;  %1440 = vst [vmem:[#allocation19_spill] sm:$0xff] %v974_v56  ;;  %v71_v0 = vld [vmem:[%s1400_s0 + $0x1f8] sm:$0xff]  ;;  %v982_v16 = vmax.f32 %v70_v51, 0.0  ;;  %v199_v59 = vmul.f32 %v974_v56, %v974_v56  ;;  %v323_v13 = vsel %vm203_vm0, %v198_v43, 0.0 }
  0x73   :  { %v314_v52 = vadd.f32 %v313_v24, %v312_v34  ;;  %1441 = vst [vmem:[#allocation20_spill] sm:$0xff] %v982_v16  ;;  %v72_v24 = vld [vmem:[%s1400_s0 + $0x200] sm:$0x1]  ;;  %v990_v34 = vmax.f32 %v71_v0, 0.0 }
  0x74   :  { %v995_v51 = vmax.f32 %v72_v24, 0.0 }
  0x75   :  { %v316_v2 = vadd.f32 %v315_v47, %v314_v52  ;;  %1442 = vst [vmem:[#allocation21_spill] sm:$0xff] %v990_v34  ;;  %v200_v52 = vmul.f32 %v982_v16, %v982_v16  ;;  %v201_v26 = vmul.f32 %v990_v34, %v990_v34 }
  0x76   :  { %1443 = vst [vmem:[#allocation22_spill] sm:$0xff] %v995_v51 }
  0x77   :  { %v318_v32 = vadd.f32 %v317_v63, %v316_v2  ;;  %v325_v63 = vsel %vm203_vm0, %v199_v59, 0.0  ;;  %v202_v2 = vmul.f32 %v995_v51, %v995_v51  ;;  %v327_v27 = vsel %vm203_vm0, %v200_v52, 0.0 }
  0x78   :  { %v329_v24 = vsel %vm203_vm0, %v201_v26, 0.0 }
  0x79   :  { %v320_v47 = vadd.f32 %v319_v19, %v318_v32  ;;  %v332_v16 = vsel %vm331_vm1, %v202_v2, 0.0  ;;  %v1448_v2 = vld [vmem:[#allocation6_spill] sm:$0xff] }
  0x7b   :  { %v322_v41 = vadd.f32 %v321_v37, %v320_v47 }
  0x7d   :  { %v324_v0 = vadd.f32 %v323_v13, %v322_v41 }
  0x7f   :  { %v326_v19 = vadd.f32 %v325_v63, %v324_v0 }
  0x81   :  { %v328_v32 = vadd.f32 %v327_v27, %v326_v19  ;;  %v1449_v19 = vld [vmem:[#allocation7_spill] sm:$0xff] }
  0x83   :  { %v330_v43 = vadd.f32 %v329_v24, %v328_v32  ;;  %v1450_v32 = vld [vmem:[#allocation8_spill] sm:$0xff] }
  0x85   :  { %v333_v37 = vadd.f32 %v332_v16, %v330_v43 }
  0x87   :  { %v334_v47 = vrot.slane %v333_v37, 4 }
  0x89   :  { %v335_v56 = vadd.f32 %v334_v47, %v333_v37  ;;  %v1451_v37 = vld [vmem:[#allocation9_spill] sm:$0xff] }
  0x8b   :  { %v336_v34 = vrot.slane %v335_v56, 2 }
  0x8d   :  { %v337_v12 = vadd.f32 %v336_v34, %v335_v56 }
  0x8f   :  { %v338_v59 = vrot.slane %v337_v12, 1 }
  0x91   :  { %v339_v41 = vadd.f32 %v338_v59, %v337_v12  ;;  %v1452_v59 = vld [vmem:[#allocation10_spill] sm:$0xff] }
  0x93   :  { %v340_v13 = vmax.f32 %v339_v41, 1e-24 }
  0x95   :  { %476 = vrsqrt.f32 %v340_v13  ;;  %v1453_v13 = vld [vmem:[#allocation11_spill] sm:$0xff] }
  0x9f   :  { %v1008_v51 = vpop.eup %476 }
  0xa0   :  { %v342_v52 = vmul.f32 %v1008_v51, %v500_v4  ;;  %v343_v26 = vmul.f32 %v1008_v51, %v502_v5  ;;  %v344_v63 = vmul.f32 %v1008_v51, %v504_v6  ;;  %v345_v16 = vmul.f32 %v1008_v51, %v509_v8 }
  0xa1   :  { %v346_v56 = vmul.f32 %v1008_v51, %v517_v11  ;;  %v347_v12 = vmul.f32 %v1008_v51, %v525_v15  ;;  %v348_v34 = vmul.f32 %v1008_v51, %v532_v18  ;;  %v349_v4 = vmul.f32 %v1008_v51, %v542_v25 }
  0xa2   :  { %407 = vst.msk [vmem:[%s1401_s1] sm:$0xff] %vm203_vm0, %v342_v52  ;;  %408 = vst.msk [vmem:[%s1401_s1 + $0x8] sm:$0xff] %vm203_vm0, %v343_v26  ;;  %v350_v5 = vmul.f32 %v1008_v51, %v550_v30  ;;  %v351_v6 = vmul.f32 %v1008_v51, %v558_v35  ;;  %v352_v8 = vmul.f32 %v1008_v51, %v566_v40  ;;  %v1454_v26 = vld [vmem:[#allocation12_spill] sm:$0xff] }
  0xa3   :  { %409 = vst.msk [vmem:[%s1401_s1 + $0x10] sm:$0xff] %vm203_vm0, %v344_v63  ;;  %410 = vst.msk [vmem:[%s1401_s1 + $0x18] sm:$0xff] %vm203_vm0, %v345_v16  ;;  %v353_v11 = vmul.f32 %v1008_v51, %v574_v45  ;;  %v354_v15 = vmul.f32 %v1008_v51, %v582_v50  ;;  %v355_v18 = vmul.f32 %v1008_v51, %v590_v55  ;;  %v1455_v16 = vld [vmem:[#allocation13_spill] sm:$0xff] }
  0xa4   :  { %411 = vst.msk [vmem:[%s1401_s1 + $0x20] sm:$0xff] %vm203_vm0, %v346_v56  ;;  %412 = vst.msk [vmem:[%s1401_s1 + $0x28] sm:$0xff] %vm203_vm0, %v347_v12  ;;  %v356_v25 = vmul.f32 %v1008_v51, %v598_v60  ;;  %v357_v30 = vmul.f32 %v1008_v51, %v606_v1  ;;  %v358_v35 = vmul.f32 %v1008_v51, %v614_v10  ;;  %v1456_v12 = vld [vmem:[#allocation14_spill] sm:$0xff] }
  0xa5   :  { %413 = vst.msk [vmem:[%s1401_s1 + $0x30] sm:$0xff] %vm203_vm0, %v348_v34  ;;  %414 = vst.msk [vmem:[%s1401_s1 + $0x38] sm:$0xff] %vm203_vm0, %v349_v4  ;;  %v359_v40 = vmul.f32 %v1008_v51, %v622_v17  ;;  %v360_v45 = vmul.f32 %v1008_v51, %v630_v23  ;;  %v361_v50 = vmul.f32 %v1008_v51, %v638_v29  ;;  %v1457_v4 = vld [vmem:[#allocation15_spill] sm:$0xff] }
  0xa6   :  { %415 = vst.msk [vmem:[%s1401_s1 + $0x40] sm:$0xff] %vm203_vm0, %v350_v5  ;;  %416 = vst.msk [vmem:[%s1401_s1 + $0x48] sm:$0xff] %vm203_vm0, %v351_v6  ;;  %v362_v55 = vmul.f32 %v1008_v51, %v646_v36  ;;  %v363_v60 = vmul.f32 %v1008_v51, %v654_v42  ;;  %v364_v1 = vmul.f32 %v1008_v51, %v662_v48  ;;  %v1458_v6 = vld [vmem:[#allocation16_spill] sm:$0xff] }
  0xa7   :  { %417 = vst.msk [vmem:[%s1401_s1 + $0x50] sm:$0xff] %vm203_vm0, %v352_v8  ;;  %418 = vst.msk [vmem:[%s1401_s1 + $0x58] sm:$0xff] %vm203_vm0, %v353_v11  ;;  %v365_v10 = vmul.f32 %v1008_v51, %v670_v54  ;;  %v366_v17 = vmul.f32 %v1008_v51, %v678_v61  ;;  %v367_v23 = vmul.f32 %v1008_v51, %v686_v3  ;;  %v1459_v11 = vld [vmem:[#allocation17_spill] sm:$0xff] }
  0xa8   :  { %419 = vst.msk [vmem:[%s1401_s1 + $0x60] sm:$0xff] %vm203_vm0, %v354_v15  ;;  %420 = vst.msk [vmem:[%s1401_s1 + $0x68] sm:$0xff] %vm203_vm0, %v355_v18  ;;  %v368_v29 = vmul.f32 %v1008_v51, %v694_v14  ;;  %v369_v36 = vmul.f32 %v1008_v51, %v702_v22  ;;  %v370_v42 = vmul.f32 %v1008_v51, %v710_v31  ;;  %v1460_v18 = vld [vmem:[#allocation18_spill] sm:$0xff] }
  0xa9   :  { %421 = vst.msk [vmem:[%s1401_s1 + $0x70] sm:$0xff] %vm203_vm0, %v356_v25  ;;  %422 = vst.msk [vmem:[%s1401_s1 + $0x78] sm:$0xff] %vm203_vm0, %v357_v30  ;;  %v371_v48 = vmul.f32 %v1008_v51, %v718_v38  ;;  %v372_v54 = vmul.f32 %v1008_v51, %v726_v46  ;;  %v373_v61 = vmul.f32 %v1008_v51, %v734_v53  ;;  %v1461_v30 = vld [vmem:[#allocation19_spill] sm:$0xff] }
  0xaa   :  { %423 = vst.msk [vmem:[%s1401_s1 + $0x80] sm:$0xff] %vm203_vm0, %v358_v35  ;;  %424 = vst.msk [vmem:[%s1401_s1 + $0x88] sm:$0xff] %vm203_vm0, %v359_v40  ;;  %v374_v3 = vmul.f32 %v1008_v51, %v742_v62  ;;  %v375_v14 = vmul.f32 %v1008_v51, %v750_v9  ;;  %v376_v22 = vmul.f32 %v1008_v51, %v758_v20  ;;  %v1462_v40 = vld [vmem:[#allocation20_spill] sm:$0xff] }
  0xab   :  { %425 = vst.msk [vmem:[%s1401_s1 + $0x90] sm:$0xff] %vm203_vm0, %v360_v45  ;;  %426 = vst.msk [vmem:[%s1401_s1 + $0x98] sm:$0xff] %vm203_vm0, %v361_v50  ;;  %v377_v31 = vmul.f32 %v1008_v51, %v766_v28  ;;  %v378_v38 = vmul.f32 %v1008_v51, %v774_v39  ;;  %v379_v46 = vmul.f32 %v1008_v51, %v782_v49  ;;  %v1444_v49 = vld [vmem:[#allocation2_spill] sm:$0xff]  ;;  %v1463_v50 = vld [vmem:[#allocation21_spill] sm:$0xff] }
  0xac   :  { %427 = vst.msk [vmem:[%s1401_s1 + $0xa0] sm:$0xff] %vm203_vm0, %v362_v55  ;;  %428 = vst.msk [vmem:[%s1401_s1 + $0xa8] sm:$0xff] %vm203_vm0, %v363_v60  ;;  %v380_v53 = vmul.f32 %v1008_v51, %v790_v58  ;;  %v381_v62 = vmul.f32 %v1008_v51, %v798_v7  ;;  %v382_v9 = vmul.f32 %v1008_v51, %v806_v21  ;;  %v1445_v7 = vld [vmem:[#allocation3_spill] sm:$0xff]  ;;  %v1464_v60 = vld [vmem:[#allocation22_spill] sm:$0xff] }
  0xad   :  { %429 = vst.msk [vmem:[%s1401_s1 + $0xb0] sm:$0xff] %vm203_vm0, %v364_v1  ;;  %430 = vst.msk [vmem:[%s1401_s1 + $0xb8] sm:$0xff] %vm203_vm0, %v365_v10  ;;  %v383_v20 = vmul.f32 %v1008_v51, %v814_v33  ;;  %v384_v28 = vmul.f32 %v1008_v51, %v822_v44  ;;  %v385_v39 = vmul.f32 %v1008_v51, %v830_v57  ;;  %v1446_v33 = vld [vmem:[#allocation4_spill] sm:$0xff]  ;;  %v1447_v57 = vld [vmem:[#allocation5_spill] sm:$0xff] }
  0xae   :  { %431 = vst.msk [vmem:[%s1401_s1 + $0xc0] sm:$0xff] %vm203_vm0, %v366_v17  ;;  %432 = vst.msk [vmem:[%s1401_s1 + $0xc8] sm:$0xff] %vm203_vm0, %v367_v23  ;;  %v386_v58 = vmul.f32 %v1008_v51, %v1444_v49  ;;  %v387_v21 = vmul.f32 %v1008_v51, %v1445_v7  ;;  %v388_v44 = vmul.f32 %v1008_v51, %v1446_v33 }
  0xaf   :  { %433 = vst.msk [vmem:[%s1401_s1 + $0xd0] sm:$0xff] %vm203_vm0, %v368_v29  ;;  %434 = vst.msk [vmem:[%s1401_s1 + $0xd8] sm:$0xff] %vm203_vm0, %v369_v36  ;;  %v389_v0 = vmul.f32 %v1008_v51, %v1447_v57  ;;  %v390_v27 = vmul.f32 %v1008_v51, %v1448_v2  ;;  %v391_v24 = vmul.f32 %v1008_v51, %v1449_v19 }
  0xb0   :  { %435 = vst.msk [vmem:[%s1401_s1 + $0xe0] sm:$0xff] %vm203_vm0, %v370_v42  ;;  %436 = vst.msk [vmem:[%s1401_s1 + $0xe8] sm:$0xff] %vm203_vm0, %v371_v48  ;;  %v392_v43 = vmul.f32 %v1008_v51, %v1450_v32  ;;  %v393_v47 = vmul.f32 %v1008_v51, %v1451_v37  ;;  %v394_v41 = vmul.f32 %v1008_v51, %v1452_v59 }
  0xb1   :  { %437 = vst.msk [vmem:[%s1401_s1 + $0xf0] sm:$0xff] %vm203_vm0, %v372_v54  ;;  %438 = vst.msk [vmem:[%s1401_s1 + $0xf8] sm:$0xff] %vm203_vm0, %v373_v61  ;;  %v395_v52 = vmul.f32 %v1008_v51, %v1453_v13  ;;  %v396_v63 = vmul.f32 %v1008_v51, %v1454_v26  ;;  %v397_v56 = vmul.f32 %v1008_v51, %v1455_v16 }
  0xb2   :  { %439 = vst.msk [vmem:[%s1401_s1 + $0x100] sm:$0xff] %vm203_vm0, %v374_v3  ;;  %440 = vst.msk [vmem:[%s1401_s1 + $0x108] sm:$0xff] %vm203_vm0, %v375_v14  ;;  %v398_v34 = vmul.f32 %v1008_v51, %v1456_v12  ;;  %v399_v5 = vmul.f32 %v1008_v51, %v1457_v4  ;;  %v400_v8 = vmul.f32 %v1008_v51, %v1458_v6 }
  0xb3   :  { %441 = vst.msk [vmem:[%s1401_s1 + $0x110] sm:$0xff] %vm203_vm0, %v376_v22  ;;  %442 = vst.msk [vmem:[%s1401_s1 + $0x118] sm:$0xff] %vm203_vm0, %v377_v31  ;;  %v401_v15 = vmul.f32 %v1008_v51, %v1459_v11  ;;  %v402_v25 = vmul.f32 %v1008_v51, %v1460_v18  ;;  %v403_v35 = vmul.f32 %v1008_v51, %v1461_v30 }
  0xb4   :  { %443 = vst.msk [vmem:[%s1401_s1 + $0x120] sm:$0xff] %vm203_vm0, %v378_v38  ;;  %444 = vst.msk [vmem:[%s1401_s1 + $0x128] sm:$0xff] %vm203_vm0, %v379_v46  ;;  %v404_v45 = vmul.f32 %v1008_v51, %v1462_v40  ;;  %v405_v55 = vmul.f32 %v1008_v51, %v1463_v50  ;;  %v406_v1 = vmul.f32 %v1008_v51, %v1464_v60 }
  0xb5   :  { %445 = vst.msk [vmem:[%s1401_s1 + $0x130] sm:$0xff] %vm203_vm0, %v380_v53  ;;  %446 = vst.msk [vmem:[%s1401_s1 + $0x138] sm:$0xff] %vm203_vm0, %v381_v62 }
  0xb6   :  { %447 = vst.msk [vmem:[%s1401_s1 + $0x140] sm:$0xff] %vm203_vm0, %v382_v9  ;;  %448 = vst.msk [vmem:[%s1401_s1 + $0x148] sm:$0xff] %vm203_vm0, %v383_v20 }
  0xb7   :  { %449 = vst.msk [vmem:[%s1401_s1 + $0x150] sm:$0xff] %vm203_vm0, %v384_v28  ;;  %450 = vst.msk [vmem:[%s1401_s1 + $0x158] sm:$0xff] %vm203_vm0, %v385_v39 }
  0xb8   :  { %451 = vst.msk [vmem:[%s1401_s1 + $0x160] sm:$0xff] %vm203_vm0, %v386_v58  ;;  %452 = vst.msk [vmem:[%s1401_s1 + $0x168] sm:$0xff] %vm203_vm0, %v387_v21 }
  0xb9   :  { %453 = vst.msk [vmem:[%s1401_s1 + $0x170] sm:$0xff] %vm203_vm0, %v388_v44  ;;  %454 = vst.msk [vmem:[%s1401_s1 + $0x178] sm:$0xff] %vm203_vm0, %v389_v0 }
  0xba   :  { %455 = vst.msk [vmem:[%s1401_s1 + $0x180] sm:$0xff] %vm203_vm0, %v390_v27  ;;  %456 = vst.msk [vmem:[%s1401_s1 + $0x188] sm:$0xff] %vm203_vm0, %v391_v24 }
  0xbb   :  { %457 = vst.msk [vmem:[%s1401_s1 + $0x190] sm:$0xff] %vm203_vm0, %v392_v43  ;;  %458 = vst.msk [vmem:[%s1401_s1 + $0x198] sm:$0xff] %vm203_vm0, %v393_v47 }
  0xbc   :  { %459 = vst.msk [vmem:[%s1401_s1 + $0x1a0] sm:$0xff] %vm203_vm0, %v394_v41  ;;  %460 = vst.msk [vmem:[%s1401_s1 + $0x1a8] sm:$0xff] %vm203_vm0, %v395_v52 }
  0xbd   :  { %461 = vst.msk [vmem:[%s1401_s1 + $0x1b0] sm:$0xff] %vm203_vm0, %v396_v63  ;;  %462 = vst.msk [vmem:[%s1401_s1 + $0x1b8] sm:$0xff] %vm203_vm0, %v397_v56 }
  0xbe   :  { %463 = vst.msk [vmem:[%s1401_s1 + $0x1c0] sm:$0xff] %vm203_vm0, %v398_v34  ;;  %464 = vst.msk [vmem:[%s1401_s1 + $0x1c8] sm:$0xff] %vm203_vm0, %v399_v5 }
  0xbf   :  { %465 = vst.msk [vmem:[%s1401_s1 + $0x1d0] sm:$0xff] %vm203_vm0, %v400_v8  ;;  %466 = vst.msk [vmem:[%s1401_s1 + $0x1d8] sm:$0xff] %vm203_vm0, %v401_v15 }
  0xc0   :  { %467 = vst.msk [vmem:[%s1401_s1 + $0x1e0] sm:$0xff] %vm203_vm0, %v402_v25  ;;  %468 = vst.msk [vmem:[%s1401_s1 + $0x1e8] sm:$0xff] %vm203_vm0, %v403_v35 }
  0xc1   :  { %469 = vst.msk [vmem:[%s1401_s1 + $0x1f0] sm:$0xff] %vm203_vm0, %v404_v45  ;;  %470 = vst.msk [vmem:[%s1401_s1 + $0x1f8] sm:$0xff] %vm203_vm0, %v405_v55 }
  0xc2   :  { %471 = vst.msk [vmem:[%s1401_s1 + $0x200] sm:$0x1] %vm331_vm1, %v406_v1 }

// kernel: nmf_d_forward.3
= control target key start
LH: loop header
LB: loop body
LE: loop exit
PB: predicated region body
PF: predicated region fallthrough
CT: control target
= control target key end

     0   :  { %s2292_s9 = smov 0   ;;  %s2294_s10 = smov 0   ;;  %s3056_s0 = inlined_call_operand.vmem [shape: f32[513,30], index: 0, kind: input, shape index: {}]   ;;  %s3057_s1 = inlined_call_operand.vmem [shape: f32[2,30,384], index: 1, kind: input, shape index: {}]   ;;  %s3058_s2 = inlined_call_operand.vmem [shape: f32[2,513,384], index: 2, kind: output, shape index: {}]  }
   0x1   :  { %s2296_s11 = smov 0  }
   0x2 LB: > { %s24_s12 = sadd.s32 1, %s2267_s10  ;;  %p1792_p0 = scmp.ge.s32.totalorder %s2271_s11, 1  ;;  %s2271_s11 = sphi %s2296_s11, %s12_s11   ;;  %s2267_s10 = sphi %s2294_s10, %s3062_s10   ;;  %s2263_s9 = sphi %s2292_s9, %s3061_s9  }
   0x3   : > { %p26_p1 = scmp.ge.s32.totalorder %s24_s12, 2  ;;  %p133_p2 = scmp.lt.s32.totalorder %s2271_s11, 3 }
   0x5   : > { %s3064_s12 = smov (%p26_p1, %s24_s12), 0  ;;  %p134_p3 = pnand %p1792_p0, %p133_p2 }
   0x6   : > { %p164_p4 = scmp.lt.s32.totalorder (!%p134_p3), %s2263_s9, 1  ;;  %v2273_v0 = vmov (!%p134_p3), 0.0|0.0   ;;  %v2274_v1 = vmov (!%p134_p3), 0.0   ;;  %vm2275_vm0 = vmmov (!%p134_p3), 0   ;;  %vm456_vm1 = vcmask (!%p134_p3), 1045504   ;;  %v183_v21 = vld [vmem:[%s3056_s0] sm:$0xff] (!%p134_p3) }
   0x7   : > { %137 = sbr.rel (%p134_p3) target bundleno = 501 (0x1f5), region = 28  ;;  %2212 = vmatprep.subr.bf16.mxu1 (!%p134_p3), %v2273_v0  ;;  %530 = vmatprep.mubr.f32.mxu0 (!%p134_p3), %v2274_v1  ;;  %vm2276_vm2 = vmmov (!%p134_p3), 1   ;;  %vm260_vm4 = vcmask (!%p134_p3), 244736   ;;  %v184_v22 = vld [vmem:[%s3056_s0 + $0x8] sm:$0xff] (!%p134_p3)  ;;  %v185_v23 = vld [vmem:[%s3056_s0 + $0x10] sm:$0xff] (!%p134_p3)  ;;  %v186_v24 = vld [vmem:[%s3056_s0 + $0x18] sm:$0xff] (!%p134_p3) }
   0x8   : > { %2007 = vmatprep.mubr.msk.f32.mxu1 (!%p134_p3), %vm2275_vm0, %v2274_v1  ;;  %vm2319_vm3 = vmpackc.low (!%p134_p3), %vm456_vm1, %vm2276_vm2  ;;  %v187_v25 = vld [vmem:[%s3056_s0 + $0x20] sm:$0xff] (!%p134_p3)  ;;  %v188_v26 = vld [vmem:[%s3056_s0 + $0x28] sm:$0xff] (!%p134_p3) }
   0x9   : > { %v189_v27 = vld [vmem:[%s3056_s0 + $0x30] sm:$0xff] (!%p134_p3)  ;;  %v190_v28 = vld [vmem:[%s3056_s0 + $0x38] sm:$0xff] (!%p134_p3)  ;;  %v191_v29 = vld [vmem:[%s3056_s0 + $0x40] sm:$0xff] (!%p134_p3) }
   0xa   : > { %v192_v30 = vld [vmem:[%s3056_s0 + $0x48] sm:$0xff] (!%p134_p3)  ;;  %v193_v31 = vld [vmem:[%s3056_s0 + $0x50] sm:$0xff] (!%p134_p3)  ;;  %v194_v32 = vld [vmem:[%s3056_s0 + $0x58] sm:$0xff] (!%p134_p3) }
   0xb   : > { %v195_v33 = vld [vmem:[%s3056_s0 + $0x60] sm:$0xff] (!%p134_p3)  ;;  %v196_v34 = vld [vmem:[%s3056_s0 + $0x68] sm:$0xff] (!%p134_p3)  ;;  %v197_v35 = vld [vmem:[%s3056_s0 + $0x70] sm:$0xff] (!%p134_p3) }
   0xc   : > { %v198_v36 = vld [vmem:[%s3056_s0 + $0x78] sm:$0xff] (!%p134_p3)  ;;  %v199_v37 = vld [vmem:[%s3056_s0 + $0x80] sm:$0xff] (!%p134_p3)  ;;  %v200_v38 = vld [vmem:[%s3056_s0 + $0x88] sm:$0xff] (!%p134_p3) }
   0xd   : > { %v201_v39 = vld [vmem:[%s3056_s0 + $0x90] sm:$0xff] (!%p134_p3)  ;;  %v202_v40 = vld [vmem:[%s3056_s0 + $0x98] sm:$0xff] (!%p134_p3)  ;;  %v203_v41 = vld [vmem:[%s3056_s0 + $0xa0] sm:$0xff] (!%p134_p3) }
   0xe   : > { %s3066_s9 = smov (!%p164_p4, %s2263_s9), 1  ;;  %v204_v42 = vld [vmem:[%s3056_s0 + $0xa8] sm:$0xff]  ;;  %v205_v43 = vld [vmem:[%s3056_s0 + $0xb0] sm:$0xff]  ;;  %v206_v44 = vld [vmem:[%s3056_s0 + $0xb8] sm:$0xff] }
   0xf   : > { %s2219_s13 = smul.u32 96, %s3066_s9  ;;  %v207_v45 = vld [vmem:[%s3056_s0 + $0xc0] sm:$0xff]  ;;  %v208_v46 = vld [vmem:[%s3056_s0 + $0xc8] sm:$0xff]  ;;  %v209_v47 = vld [vmem:[%s3056_s0 + $0xd0] sm:$0xff] }
  0x10   : > { %v210_v48 = vld [vmem:[%s3056_s0 + $0xd8] sm:$0xff]  ;;  %v211_v49 = vld [vmem:[%s3056_s0 + $0xe0] sm:$0xff]  ;;  %v212_v50 = vld [vmem:[%s3056_s0 + $0xe8] sm:$0xff]  ;;  %s2220_s27 = smul.u32 1560, %s3066_s9 }
  0x11   : > { %s171_s16 = scalar_lea.vmem %s3057_s1, %s2219_s13  ;;  %v213_v51 = vld [vmem:[%s3056_s0 + $0xf0] sm:$0xff]  ;;  %v214_v52 = vld [vmem:[%s3056_s0 + $0xf8] sm:$0xff]  ;;  %v215_v53 = vld [vmem:[%s3056_s0 + $0x100] sm:$0xff] }
  0x12   : > { %v249_v3 = vld [vmem:[%s171_s16 + $0x8] sm:$0xff]  ;;  %v252_v4 = vld [vmem:[%s171_s16 + $0x20] sm:$0xff]  ;;  %v251_v7 = vld [vmem:[%s171_s16 + $0x18] sm:$0xff]  ;;  %s2760_s4 = scalar_lea.vmem %s3058_s2, %s2220_s27 }
  0x13   : > { %v248_v5 = vld [vmem:[%s171_s16] sm:$0xff]  ;;  %v2202_v6 = vpack.c.bf16 %v252_v4, %v249_v3  ;;  %v250_v8 = vld [vmem:[%s171_s16 + $0x10] sm:$0xff]  ;;  %v253_v9 = vld [vmem:[%s171_s16 + $0x28] sm:$0xff] }
  0x14   : > { %v2204_v10 = vpack.c.bf16 %v251_v7, %v248_v5  ;;  %v2213_v11 = vpack.c.bf16 %v253_v9, %v250_v8  ;;  %v255_v12 = vld [vmem:[%s171_s16 + $0x38] sm:$0xff]  ;;  %v258_v13 = vld [vmem:[%s171_s16 + $0x50] sm:$0x3f]  ;;  %v257_v16 = vld [vmem:[%s171_s16 + $0x48] sm:$0x3f] }
  0x15   : > { %v254_v14 = vld [vmem:[%s171_s16 + $0x30] sm:$0xff]  ;;  %2203 = vmatprep.subr.bf16.mxu0 %v2202_v6  ;;  %v2206_v15 = vpack.c.bf16 %v258_v13, %v255_v12  ;;  %v256_v17 = vld [vmem:[%s171_s16 + $0x40] sm:$0xff]  ;;  %v259_v18 = vld [vmem:[%s171_s16 + $0x58] sm:$0x3f] }
  0x16   : > { %2205 = vmatpush1.bf16.msra.mxu0 %v2204_v10  ;;  %2214 = vmatpush3.bf16.msra.mxu1 %v2213_v11  ;;  %v2209_v19 = vpack.c.bf16 %v257_v16, %v254_v14  ;;  %v2216_v20 = vpack.c.bf16 %v259_v18, %v256_v17  ;;  %v216_v54 = vld [vmem:[%s3056_s0 + $0x108] sm:$0xff]  ;;  %v217_v55 = vld [vmem:[%s3056_s0 + $0x110] sm:$0xff]  ;;  %v218_v56 = vld [vmem:[%s3056_s0 + $0x118] sm:$0xff] }
  0x17   : > { %2208 = vmatprep.subr.msk.bf16.mxu0 %vm2319_vm3, %v2206_v15  ;;  %2215 = vmatprep.subr.bf16.mxu1 %v2273_v0  ;;  %v219_v57 = vld [vmem:[%s3056_s0 + $0x120] sm:$0xff]  ;;  %v220_v58 = vld [vmem:[%s3056_s0 + $0x128] sm:$0xff]  ;;  %v221_v59 = vld [vmem:[%s3056_s0 + $0x130] sm:$0xff] }
  0x18   : > { %v222_v60 = vld [vmem:[%s3056_s0 + $0x138] sm:$0xff]  ;;  %v223_v61 = vld [vmem:[%s3056_s0 + $0x140] sm:$0xff]  ;;  %v224_v62 = vld [vmem:[%s3056_s0 + $0x148] sm:$0xff] }
  0x19   : > { %v225_v63 = vld [vmem:[%s3056_s0 + $0x150] sm:$0xff]  ;;  %v226_v0 = vld [vmem:[%s3056_s0 + $0x158] sm:$0xff]  ;;  %v227_v2 = vld [vmem:[%s3056_s0 + $0x160] sm:$0xff] }
  0x1a   : > { %2211 = vmatpush1.bf16.msk.msra.mxu0 %vm2319_vm3, %v2209_v19  ;;  %2218 = vmatpush3.bf16.msk.msra.mxu1 %vm2319_vm3, %v2216_v20  ;;  %v228_v3 = vld [vmem:[%s3056_s0 + $0x168] sm:$0xff]  ;;  %v229_v4 = vld [vmem:[%s3056_s0 + $0x170] sm:$0xff]  ;;  %v230_v5 = vld [vmem:[%s3056_s0 + $0x178] sm:$0xff] }
  0x1b   : > { %v231_v6 = vld [vmem:[%s3056_s0 + $0x180] sm:$0xff]  ;;  %v232_v7 = vld [vmem:[%s3056_s0 + $0x188] sm:$0xff]  ;;  %v233_v8 = vld [vmem:[%s3056_s0 + $0x190] sm:$0xff] }
  0x1c   : > { %v234_v9 = vld [vmem:[%s3056_s0 + $0x198] sm:$0xff]  ;;  %v235_v10 = vld [vmem:[%s3056_s0 + $0x1a0] sm:$0xff]  ;;  %v236_v11 = vld [vmem:[%s3056_s0 + $0x1a8] sm:$0xff] }
  0x1d   : > { %1797 = vmatmul.mubr.msk.f32.vlgmr.msra.gmra.mrb[0].mxu0 %vm260_vm4, %v183_v21  ;;  %2008 = vmatmul.mubr.msk.f32.vlgmr.msra.gmra.mrb[0].mxu1 %vm260_vm4, %v183_v21  ;;  %v237_v19 = vld [vmem:[%s3056_s0 + $0x1b0] sm:$0xff] }
  0x1e   : > { %536 = vmatprep.mubr.f32.mxu0 %v2274_v1  ;;  %2010 = vmatprep.mubr.msk.f32.mxu1 %vm2275_vm0, %v2274_v1 }
  0x21   : > { %1798 = vmatmul.mubr.msk.f32.gmra.mrb[2].mxu0 %vm260_vm4, %v184_v22  ;;  %2011 = vmatmul.mubr.msk.f32.gmra.mrb[2].mxu1 %vm260_vm4, %v184_v22 }
  0x22   : > { %542 = vmatprep.mubr.f32.mxu0 %v2274_v1  ;;  %2013 = vmatprep.mubr.msk.f32.mxu1 %vm2275_vm0, %v2274_v1 }
  0x25   : > { %1799 = vmatmul.mubr.msk.f32.gmra.mrb[4].mxu0 %vm260_vm4, %v185_v23  ;;  %2014 = vmatmul.mubr.msk.f32.gmra.mrb[4].mxu1 %vm260_vm4, %v185_v23 }
  0x26   : > { %548 = vmatprep.mubr.f32.mxu0 %v2274_v1  ;;  %2016 = vmatprep.mubr.msk.f32.mxu1 %vm2275_vm0, %v2274_v1 }
  0x29   : > { %1800 = vmatmul.mubr.msk.f32.gmra.mrb[6].mxu0 %vm260_vm4, %v186_v24  ;;  %2017 = vmatmul.mubr.msk.f32.gmra.mrb[6].mxu1 %vm260_vm4, %v186_v24 }
  0x2a   : > { %554 = vmatprep.mubr.f32.mxu0 %v2274_v1  ;;  %2019 = vmatprep.mubr.msk.f32.mxu1 %vm2275_vm0, %v2274_v1 }
  0x2d   : > { %1801 = vmatmul.mubr.msk.f32.gmra.mrb[8].mxu0 %vm260_vm4, %v187_v25  ;;  %2020 = vmatmul.mubr.msk.f32.gmra.mrb[8].mxu1 %vm260_vm4, %v187_v25 }
  0x2e   : > { %560 = vmatprep.mubr.f32.mxu0 %v2274_v1  ;;  %2022 = vmatprep.mubr.msk.f32.mxu1 %vm2275_vm0, %v2274_v1 }
  0x31   : > { %1802 = vmatmul.mubr.msk.f32.gmra.mrb[10].mxu0 %vm260_vm4, %v188_v26  ;;  %2023 = vmatmul.mubr.msk.f32.gmra.mrb[10].mxu1 %vm260_vm4, %v188_v26 }
  0x32   : > { %566 = vmatprep.mubr.f32.mxu0 %v2274_v1  ;;  %2025 = vmatprep.mubr.msk.f32.mxu1 %vm2275_vm0, %v2274_v1 }
  0x35   : > { %1803 = vmatmul.mubr.msk.f32.gmra.mrb[12].mxu0 %vm260_vm4, %v189_v27  ;;  %2026 = vmatmul.mubr.msk.f32.gmra.mrb[12].mxu1 %vm260_vm4, %v189_v27  ;;  %v238_v27 = vld [vmem:[%s3056_s0 + $0x1b8] sm:$0xff] }
  0x36   : > { %572 = vmatprep.mubr.f32.mxu0 %v2274_v1  ;;  %2028 = vmatprep.mubr.msk.f32.mxu1 %vm2275_vm0, %v2274_v1 }
  0x39   : > { %1804 = vmatmul.mubr.msk.f32.gmra.mrb[14].mxu0 %vm260_vm4, %v190_v28  ;;  %2029 = vmatmul.mubr.msk.f32.gmra.mrb[14].mxu1 %vm260_vm4, %v190_v28 }
  0x3a   : > { %578 = vmatprep.mubr.f32.mxu0 %v2274_v1  ;;  %2031 = vmatprep.mubr.msk.f32.mxu1 %vm2275_vm0, %v2274_v1 }
  0x3d   : > { %1805 = vmatmul.mubr.msk.f32.gmra.mrb[16].mxu0 %vm260_vm4, %v191_v29  ;;  %2032 = vmatmul.mubr.msk.f32.gmra.mrb[16].mxu1 %vm260_vm4, %v191_v29 }
  0x3e   : > { %584 = vmatprep.mubr.f32.mxu0 %v2274_v1  ;;  %2034 = vmatprep.mubr.msk.f32.mxu1 %vm2275_vm0, %v2274_v1 }
  0x41   : > { %1806 = vmatmul.mubr.msk.f32.gmra.mrb[18].mxu0 %vm260_vm4, %v192_v30  ;;  %2035 = vmatmul.mubr.msk.f32.gmra.mrb[18].mxu1 %vm260_vm4, %v192_v30 }
  0x42   : > { %590 = vmatprep.mubr.f32.mxu0 %v2274_v1  ;;  %2037 = vmatprep.mubr.msk.f32.mxu1 %vm2275_vm0, %v2274_v1 }
  0x45   : > { %1807 = vmatmul.mubr.msk.f32.gmra.mrb[20].mxu0 %vm260_vm4, %v193_v31  ;;  %2038 = vmatmul.mubr.msk.f32.gmra.mrb[20].mxu1 %vm260_vm4, %v193_v31 }
  0x46   : > { %596 = vmatprep.mubr.f32.mxu0 %v2274_v1  ;;  %2040 = vmatprep.mubr.msk.f32.mxu1 %vm2275_vm0, %v2274_v1 }
  0x49   : > { %1808 = vmatmul.mubr.msk.f32.gmra.mrb[22].mxu0 %vm260_vm4, %v194_v32  ;;  %2041 = vmatmul.mubr.msk.f32.gmra.mrb[22].mxu1 %vm260_vm4, %v194_v32 }
  0x4a   : > { %602 = vmatprep.mubr.f32.mxu0 %v2274_v1  ;;  %2043 = vmatprep.mubr.msk.f32.mxu1 %vm2275_vm0, %v2274_v1 }
  0x4d   : > { %1809 = vmatmul.mubr.msk.f32.gmra.mrb[24].mxu0 %vm260_vm4, %v195_v33  ;;  %2044 = vmatmul.mubr.msk.f32.gmra.mrb[24].mxu1 %vm260_vm4, %v195_v33 }
  0x4e   : > { %608 = vmatprep.mubr.f32.mxu0 %v2274_v1  ;;  %2046 = vmatprep.mubr.msk.f32.mxu1 %vm2275_vm0, %v2274_v1 }
  0x51   : > { %1810 = vmatmul.mubr.msk.f32.gmra.mrb[26].mxu0 %vm260_vm4, %v196_v34  ;;  %2047 = vmatmul.mubr.msk.f32.gmra.mrb[26].mxu1 %vm260_vm4, %v196_v34 }
  0x52   : > { %614 = vmatprep.mubr.f32.mxu0 %v2274_v1  ;;  %2049 = vmatprep.mubr.msk.f32.mxu1 %vm2275_vm0, %v2274_v1 }
  0x55   : > { %1811 = vmatmul.mubr.msk.f32.gmra.mrb[28].mxu0 %vm260_vm4, %v197_v35  ;;  %2050 = vmatmul.mubr.msk.f32.gmra.mrb[28].mxu1 %vm260_vm4, %v197_v35  ;;  %v239_v35 = vld [vmem:[%s3056_s0 + $0x1c0] sm:$0xff] }
  0x56   : > { %620 = vmatprep.mubr.f32.mxu0 %v2274_v1  ;;  %2052 = vmatprep.mubr.msk.f32.mxu1 %vm2275_vm0, %v2274_v1 }
  0x59   : > { %1812 = vmatmul.mubr.msk.f32.gmra.mrb[30].mxu0 %vm260_vm4, %v198_v36  ;;  %2053 = vmatmul.mubr.msk.f32.gmra.mrb[30].mxu1 %vm260_vm4, %v198_v36 }
  0x5a   : > { %626 = vmatprep.mubr.f32.mxu0 %v2274_v1  ;;  %2055 = vmatprep.mubr.msk.f32.mxu1 %vm2275_vm0, %v2274_v1 }
  0x5d   : > { %1813 = vmatmul.mubr.msk.f32.gmra.mrb[32].mxu0 %vm260_vm4, %v199_v37  ;;  %2056 = vmatmul.mubr.msk.f32.gmra.mrb[32].mxu1 %vm260_vm4, %v199_v37 }
  0x5e   : > { %632 = vmatprep.mubr.f32.mxu0 %v2274_v1  ;;  %2058 = vmatprep.mubr.msk.f32.mxu1 %vm2275_vm0, %v2274_v1 }
  0x61   : > { %1814 = vmatmul.mubr.msk.f32.gmra.mrb[34].mxu0 %vm260_vm4, %v200_v38  ;;  %2059 = vmatmul.mubr.msk.f32.gmra.mrb[34].mxu1 %vm260_vm4, %v200_v38 }
  0x62   : > { %638 = vmatprep.mubr.f32.mxu0 %v2274_v1  ;;  %2061 = vmatprep.mubr.msk.f32.mxu1 %vm2275_vm0, %v2274_v1 }
  0x65   : > { %1815 = vmatmul.mubr.msk.f32.gmra.mrb[36].mxu0 %vm260_vm4, %v201_v39  ;;  %2062 = vmatmul.mubr.msk.f32.gmra.mrb[36].mxu1 %vm260_vm4, %v201_v39 }
  0x66   : > { %644 = vmatprep.mubr.f32.mxu0 %v2274_v1  ;;  %2064 = vmatprep.mubr.msk.f32.mxu1 %vm2275_vm0, %v2274_v1 }
  0x69   : > { %1816 = vmatmul.mubr.msk.f32.gmra.mrb[38].mxu0 %vm260_vm4, %v202_v40  ;;  %2065 = vmatmul.mubr.msk.f32.gmra.mrb[38].mxu1 %vm260_vm4, %v202_v40 }
  0x6a   : > { %650 = vmatprep.mubr.f32.mxu0 %v2274_v1  ;;  %2067 = vmatprep.mubr.msk.f32.mxu1 %vm2275_vm0, %v2274_v1 }
  0x6d   : > { %1817 = vmatmul.mubr.msk.f32.gmra.mrb[40].mxu0 %vm260_vm4, %v203_v41  ;;  %2068 = vmatmul.mubr.msk.f32.gmra.mrb[40].mxu1 %vm260_vm4, %v203_v41 }
  0x6e   : > { %656 = vmatprep.mubr.f32.mxu0 %v2274_v1  ;;  %2070 = vmatprep.mubr.msk.f32.mxu1 %vm2275_vm0, %v2274_v1 }
  0x71   : > { %1818 = vmatmul.mubr.msk.f32.gmra.mrb[42].mxu0 %vm260_vm4, %v204_v42  ;;  %2071 = vmatmul.mubr.msk.f32.gmra.mrb[42].mxu1 %vm260_vm4, %v204_v42 }
  0x72   : > { %662 = vmatprep.mubr.f32.mxu0 %v2274_v1  ;;  %2073 = vmatprep.mubr.msk.f32.mxu1 %vm2275_vm0, %v2274_v1 }
  0x75   : > { %1819 = vmatmul.mubr.msk.f32.gmra.mrb[44].mxu0 %vm260_vm4, %v205_v43  ;;  %2074 = vmatmul.mubr.msk.f32.gmra.mrb[44].mxu1 %vm260_vm4, %v205_v43  ;;  %v240_v43 = vld [vmem:[%s3056_s0 + $0x1c8] sm:$0xff] }
  0x76   : > { %668 = vmatprep.mubr.f32.mxu0 %v2274_v1  ;;  %2076 = vmatprep.mubr.msk.f32.mxu1 %vm2275_vm0, %v2274_v1 }
  0x79   : > { %1820 = vmatmul.mubr.msk.f32.gmra.mrb[46].mxu0 %vm260_vm4, %v206_v44  ;;  %2077 = vmatmul.mubr.msk.f32.gmra.mrb[46].mxu1 %vm260_vm4, %v206_v44 }
  0x7a   : > { %674 = vmatprep.mubr.f32.mxu0 %v2274_v1  ;;  %2079 = vmatprep.mubr.msk.f32.mxu1 %vm2275_vm0, %v2274_v1 }
  0x7d   : > { %1821 = vmatmul.mubr.msk.f32.gmra.mrb[48].mxu0 %vm260_vm4, %v207_v45  ;;  %2080 = vmatmul.mubr.msk.f32.gmra.mrb[48].mxu1 %vm260_vm4, %v207_v45 }
  0x7e   : > { %680 = vmatprep.mubr.f32.mxu0 %v2274_v1  ;;  %2082 = vmatprep.mubr.msk.f32.mxu1 %vm2275_vm0, %v2274_v1 }
  0x81   : > { %1822 = vmatmul.mubr.msk.f32.gmra.mrb[50].mxu0 %vm260_vm4, %v208_v46  ;;  %2083 = vmatmul.mubr.msk.f32.gmra.mrb[50].mxu1 %vm260_vm4, %v208_v46 }
  0x82   : > { %686 = vmatprep.mubr.f32.mxu0 %v2274_v1  ;;  %2085 = vmatprep.mubr.msk.f32.mxu1 %vm2275_vm0, %v2274_v1 }
  0x85   : > { %1823 = vmatmul.mubr.msk.f32.gmra.mrb[52].mxu0 %vm260_vm4, %v209_v47  ;;  %2086 = vmatmul.mubr.msk.f32.gmra.mrb[52].mxu1 %vm260_vm4, %v209_v47 }
  0x86   : > { %692 = vmatprep.mubr.f32.mxu0 %v2274_v1  ;;  %2088 = vmatprep.mubr.msk.f32.mxu1 %vm2275_vm0, %v2274_v1 }
  0x89   : > { %1824 = vmatmul.mubr.msk.f32.gmra.mrb[54].mxu0 %vm260_vm4, %v210_v48  ;;  %2089 = vmatmul.mubr.msk.f32.gmra.mrb[54].mxu1 %vm260_vm4, %v210_v48 }
  0x8a   : > { %698 = vmatprep.mubr.f32.mxu0 %v2274_v1  ;;  %2091 = vmatprep.mubr.msk.f32.mxu1 %vm2275_vm0, %v2274_v1 }
  0x8d   : > { %1825 = vmatmul.mubr.msk.f32.gmra.mrb[56].mxu0 %vm260_vm4, %v211_v49  ;;  %2092 = vmatmul.mubr.msk.f32.gmra.mrb[56].mxu1 %vm260_vm4, %v211_v49 }
  0x8e   : > { %704 = vmatprep.mubr.f32.mxu0 %v2274_v1  ;;  %2094 = vmatprep.mubr.msk.f32.mxu1 %vm2275_vm0, %v2274_v1 }
  0x91   : > { %1826 = vmatmul.mubr.msk.f32.gmra.mrb[58].mxu0 %vm260_vm4, %v212_v50  ;;  %2095 = vmatmul.mubr.msk.f32.gmra.mrb[58].mxu1 %vm260_vm4, %v212_v50 }
  0x92   : > { %710 = vmatprep.mubr.f32.mxu0 %v2274_v1  ;;  %2097 = vmatprep.mubr.msk.f32.mxu1 %vm2275_vm0, %v2274_v1 }
  0x95   : > { %1827 = vmatmul.mubr.msk.f32.gmra.mrb[60].mxu0 %vm260_vm4, %v213_v51  ;;  %2098 = vmatmul.mubr.msk.f32.gmra.mrb[60].mxu1 %vm260_vm4, %v213_v51  ;;  %v241_v51 = vld [vmem:[%s3056_s0 + $0x1d0] sm:$0xff] }
  0x96   : > { %716 = vmatprep.mubr.f32.mxu0 %v2274_v1  ;;  %2100 = vmatprep.mubr.msk.f32.mxu1 %vm2275_vm0, %v2274_v1 }
  0x99   : > { %1828 = vmatmul.mubr.msk.f32.gmra.mrb[62].mxu0 %vm260_vm4, %v214_v52  ;;  %2101 = vmatmul.mubr.msk.f32.gmra.mrb[62].mxu1 %vm260_vm4, %v214_v52 }
  0x9a   : > { %722 = vmatprep.mubr.f32.mxu0 %v2274_v1  ;;  %2103 = vmatprep.mubr.msk.f32.mxu1 %vm2275_vm0, %v2274_v1 }
  0x9d   : > { %1829 = vmatmul.mubr.msk.f32.gmra.mrb[64].mxu0 %vm260_vm4, %v215_v53  ;;  %2104 = vmatmul.mubr.msk.f32.gmra.mrb[64].mxu1 %vm260_vm4, %v215_v53 }
  0x9e   : > { %728 = vmatprep.mubr.f32.mxu0 %v2274_v1  ;;  %2106 = vmatprep.mubr.msk.f32.mxu1 %vm2275_vm0, %v2274_v1 }
  0xa1   : > { %1830 = vmatmul.mubr.msk.f32.gmra.mrb[66].mxu0 %vm260_vm4, %v216_v54  ;;  %2107 = vmatmul.mubr.msk.f32.gmra.mrb[66].mxu1 %vm260_vm4, %v216_v54 }
  0xa2   : > { %734 = vmatprep.mubr.f32.mxu0 %v2274_v1  ;;  %2109 = vmatprep.mubr.msk.f32.mxu1 %vm2275_vm0, %v2274_v1 }
  0xa5   : > { %1831 = vmatmul.mubr.msk.f32.gmra.mrb[68].mxu0 %vm260_vm4, %v217_v55  ;;  %2110 = vmatmul.mubr.msk.f32.gmra.mrb[68].mxu1 %vm260_vm4, %v217_v55 }
  0xa6   : > { %740 = vmatprep.mubr.f32.mxu0 %v2274_v1  ;;  %2112 = vmatprep.mubr.msk.f32.mxu1 %vm2275_vm0, %v2274_v1 }
  0xa9   : > { %1832 = vmatmul.mubr.msk.f32.gmra.mrb[70].mxu0 %vm260_vm4, %v218_v56  ;;  %2113 = vmatmul.mubr.msk.f32.gmra.mrb[70].mxu1 %vm260_vm4, %v218_v56 }
  0xaa   : > { %746 = vmatprep.mubr.f32.mxu0 %v2274_v1  ;;  %2115 = vmatprep.mubr.msk.f32.mxu1 %vm2275_vm0, %v2274_v1 }
  0xad   : > { %1833 = vmatmul.mubr.msk.f32.gmra.mrb[72].mxu0 %vm260_vm4, %v219_v57  ;;  %2116 = vmatmul.mubr.msk.f32.gmra.mrb[72].mxu1 %vm260_vm4, %v219_v57 }
  0xae   : > { %752 = vmatprep.mubr.f32.mxu0 %v2274_v1  ;;  %2118 = vmatprep.mubr.msk.f32.mxu1 %vm2275_vm0, %v2274_v1 }
  0xb1   : > { %1834 = vmatmul.mubr.msk.f32.gmra.mrb[74].mxu0 %vm260_vm4, %v220_v58  ;;  %2119 = vmatmul.mubr.msk.f32.gmra.mrb[74].mxu1 %vm260_vm4, %v220_v58 }
  0xb2   : > { %758 = vmatprep.mubr.f32.mxu0 %v2274_v1  ;;  %2121 = vmatprep.mubr.msk.f32.mxu1 %vm2275_vm0, %v2274_v1 }
  0xb5   : > { %1835 = vmatmul.mubr.msk.f32.gmra.mrb[76].mxu0 %vm260_vm4, %v221_v59  ;;  %2122 = vmatmul.mubr.msk.f32.gmra.mrb[76].mxu1 %vm260_vm4, %v221_v59  ;;  %v242_v59 = vld [vmem:[%s3056_s0 + $0x1d8] sm:$0xff] }
  0xb6   : > { %764 = vmatprep.mubr.f32.mxu0 %v2274_v1  ;;  %2124 = vmatprep.mubr.msk.f32.mxu1 %vm2275_vm0, %v2274_v1 }
  0xb9   : > { %1836 = vmatmul.mubr.msk.f32.gmra.mrb[78].mxu0 %vm260_vm4, %v222_v60  ;;  %2125 = vmatmul.mubr.msk.f32.gmra.mrb[78].mxu1 %vm260_vm4, %v222_v60 }
  0xba   : > { %770 = vmatprep.mubr.f32.mxu0 %v2274_v1  ;;  %2127 = vmatprep.mubr.msk.f32.mxu1 %vm2275_vm0, %v2274_v1 }
  0xbd   : > { %1837 = vmatmul.mubr.msk.f32.gmra.mrb[80].mxu0 %vm260_vm4, %v223_v61  ;;  %2128 = vmatmul.mubr.msk.f32.gmra.mrb[80].mxu1 %vm260_vm4, %v223_v61 }
  0xbe   : > { %776 = vmatprep.mubr.f32.mxu0 %v2274_v1  ;;  %2130 = vmatprep.mubr.msk.f32.mxu1 %vm2275_vm0, %v2274_v1 }
  0xc1   : > { %1838 = vmatmul.mubr.msk.f32.gmra.mrb[82].mxu0 %vm260_vm4, %v224_v62  ;;  %2131 = vmatmul.mubr.msk.f32.gmra.mrb[82].mxu1 %vm260_vm4, %v224_v62 }
  0xc2   : > { %782 = vmatprep.mubr.f32.mxu0 %v2274_v1  ;;  %2133 = vmatprep.mubr.msk.f32.mxu1 %vm2275_vm0, %v2274_v1 }
  0xc5   : > { %1839 = vmatmul.mubr.msk.f32.gmra.mrb[84].mxu0 %vm260_vm4, %v225_v63  ;;  %2134 = vmatmul.mubr.msk.f32.gmra.mrb[84].mxu1 %vm260_vm4, %v225_v63 }
  0xc6   : > { %788 = vmatprep.mubr.f32.mxu0 %v2274_v1  ;;  %2136 = vmatprep.mubr.msk.f32.mxu1 %vm2275_vm0, %v2274_v1 }
  0xc9   : > { %1840 = vmatmul.mubr.msk.f32.gmra.mrb[86].mxu0 %vm260_vm4, %v226_v0  ;;  %2137 = vmatmul.mubr.msk.f32.gmra.mrb[86].mxu1 %vm260_vm4, %v226_v0 }
  0xca   : > { %794 = vmatprep.mubr.f32.mxu0 %v2274_v1  ;;  %2139 = vmatprep.mubr.msk.f32.mxu1 %vm2275_vm0, %v2274_v1 }
  0xcd   : > { %1841 = vmatmul.mubr.msk.f32.gmra.mrb[88].mxu0 %vm260_vm4, %v227_v2  ;;  %2140 = vmatmul.mubr.msk.f32.gmra.mrb[88].mxu1 %vm260_vm4, %v227_v2 }
  0xce   : > { %800 = vmatprep.mubr.f32.mxu0 %v2274_v1  ;;  %2142 = vmatprep.mubr.msk.f32.mxu1 %vm2275_vm0, %v2274_v1 }
  0xd1   : > { %1842 = vmatmul.mubr.msk.f32.gmra.mrb[90].mxu0 %vm260_vm4, %v228_v3  ;;  %2143 = vmatmul.mubr.msk.f32.gmra.mrb[90].mxu1 %vm260_vm4, %v228_v3 }
  0xd2   : > { %806 = vmatprep.mubr.f32.mxu0 %v2274_v1  ;;  %2145 = vmatprep.mubr.msk.f32.mxu1 %vm2275_vm0, %v2274_v1 }
  0xd5   : > { %1843 = vmatmul.mubr.msk.f32.gmra.mrb[92].mxu0 %vm260_vm4, %v229_v4  ;;  %2146 = vmatmul.mubr.msk.f32.gmra.mrb[92].mxu1 %vm260_vm4, %v229_v4  ;;  %v243_v4 = vld [vmem:[%s3056_s0 + $0x1e0] sm:$0xff] }
  0xd6   : > { %812 = vmatprep.mubr.f32.mxu0 %v2274_v1  ;;  %2148 = vmatprep.mubr.msk.f32.mxu1 %vm2275_vm0, %v2274_v1 }
  0xd9   : > { %1844 = vmatmul.mubr.msk.f32.gmra.mrb[94].mxu0 %vm260_vm4, %v230_v5  ;;  %2149 = vmatmul.mubr.msk.f32.gmra.mrb[94].mxu1 %vm260_vm4, %v230_v5 }
  0xda   : > { %818 = vmatprep.mubr.f32.mxu0 %v2274_v1  ;;  %2151 = vmatprep.mubr.msk.f32.mxu1 %vm2275_vm0, %v2274_v1 }
  0xdd   : > { %1845 = vmatmul.mubr.msk.f32.gmra.mrb[96].mxu0 %vm260_vm4, %v231_v6  ;;  %2152 = vmatmul.mubr.msk.f32.gmra.mrb[96].mxu1 %vm260_vm4, %v231_v6 }
  0xde   : > { %824 = vmatprep.mubr.f32.mxu0 %v2274_v1  ;;  %2154 = vmatprep.mubr.msk.f32.mxu1 %vm2275_vm0, %v2274_v1 }
  0xe1   : > { %1846 = vmatmul.mubr.msk.f32.gmra.mrb[98].mxu0 %vm260_vm4, %v232_v7  ;;  %2155 = vmatmul.mubr.msk.f32.gmra.mrb[98].mxu1 %vm260_vm4, %v232_v7 }
  0xe2   : > { %830 = vmatprep.mubr.f32.mxu0 %v2274_v1  ;;  %2157 = vmatprep.mubr.msk.f32.mxu1 %vm2275_vm0, %v2274_v1 }
  0xe5   : > { %1847 = vmatmul.mubr.msk.f32.gmra.mrb[100].mxu0 %vm260_vm4, %v233_v8  ;;  %2158 = vmatmul.mubr.msk.f32.gmra.mrb[100].mxu1 %vm260_vm4, %v233_v8 }
  0xe6   : > { %836 = vmatprep.mubr.f32.mxu0 %v2274_v1  ;;  %2160 = vmatprep.mubr.msk.f32.mxu1 %vm2275_vm0, %v2274_v1 }
  0xe9   : > { %1848 = vmatmul.mubr.msk.f32.gmra.mrb[102].mxu0 %vm260_vm4, %v234_v9  ;;  %2161 = vmatmul.mubr.msk.f32.gmra.mrb[102].mxu1 %vm260_vm4, %v234_v9 }
  0xea   : > { %842 = vmatprep.mubr.f32.mxu0 %v2274_v1  ;;  %2163 = vmatprep.mubr.msk.f32.mxu1 %vm2275_vm0, %v2274_v1 }
  0xed   : > { %1849 = vmatmul.mubr.msk.f32.gmra.mrb[104].mxu0 %vm260_vm4, %v235_v10  ;;  %2164 = vmatmul.mubr.msk.f32.gmra.mrb[104].mxu1 %vm260_vm4, %v235_v10 }
  0xee   : > { %848 = vmatprep.mubr.f32.mxu0 %v2274_v1  ;;  %2166 = vmatprep.mubr.msk.f32.mxu1 %vm2275_vm0, %v2274_v1 }
  0xf0   : > { %v532_v12 = vpop.f32.mrb[0].mxu0  ;;  %v987_v13 = vpop.f32.mrb[0].mxu1 }
  0xf1   : > { %v1311_v14 = vmax.f32 %v532_v12, 0.0  ;;  %v1313_v15 = vmax.f32 %v987_v13, 0.0  ;;  %v534_v16 = vpop.f32.mrb[1].mxu0  ;;  %1850 = vmatmul.mubr.msk.f32.gmra.mrb[106].mxu0 %vm260_vm4, %v236_v11  ;;  %v2009_v17 = vpop.f32.mrb[1].mxu1  ;;  %2167 = vmatmul.mubr.msk.f32.gmra.mrb[106].mxu1 %vm260_vm4, %v236_v11  ;;  %v244_v12 = vld [vmem:[%s3056_s0 + $0x1e8] sm:$0xff] }
  0xf2   : > { %v1312_v18 = vmax.f32 %v534_v16, 0.0  ;;  %854 = vmatprep.mubr.f32.mxu0 %v2274_v1  ;;  %2169 = vmatprep.mubr.msk.f32.mxu1 %vm2275_vm0, %v2274_v1 }
  0xf3   : > { %1506 = vst [vmem:[%s2760_s4] sm:$0xff] %v1311_v14  ;;  %1508 = vst [vmem:[%s2760_s4 + $0x10] sm:$0xff] %v1313_v15 }
  0xf4   : > { %1507 = vst [vmem:[%s2760_s4 + $0x8] sm:$0xff] %v1312_v18  ;;  %v538_v20 = vpop.f32.mrb[2].mxu0  ;;  %v992_v21 = vpop.f32.mrb[2].mxu1 }
  0xf5   : > { %v1314_v22 = vmax.f32 %v538_v20, 0.0  ;;  %v1316_v23 = vmax.f32 %v992_v21, 0.0  ;;  %v540_v24 = vpop.f32.mrb[3].mxu0  ;;  %1851 = vmatmul.mubr.msk.f32.gmra.mrb[108].mxu0 %vm260_vm4, %v237_v19  ;;  %v2012_v25 = vpop.f32.mrb[3].mxu1  ;;  %2170 = vmatmul.mubr.msk.f32.gmra.mrb[108].mxu1 %vm260_vm4, %v237_v19  ;;  %v245_v20 = vld [vmem:[%s3056_s0 + $0x1f0] sm:$0xff] }
  0xf6   : > { %v1315_v26 = vmax.f32 %v540_v24, 0.0  ;;  %860 = vmatprep.mubr.f32.mxu0 %v2274_v1  ;;  %2172 = vmatprep.mubr.msk.f32.mxu1 %vm2275_vm0, %v2274_v1 }
  0xf7   : > { %1509 = vst [vmem:[%s2760_s4 + $0x18] sm:$0xff] %v1314_v22  ;;  %1511 = vst [vmem:[%s2760_s4 + $0x28] sm:$0xff] %v1316_v23 }
  0xf8   : > { %1510 = vst [vmem:[%s2760_s4 + $0x20] sm:$0xff] %v1315_v26  ;;  %v544_v28 = vpop.f32.mrb[4].mxu0  ;;  %v997_v29 = vpop.f32.mrb[4].mxu1 }
  0xf9   : > { %v1317_v30 = vmax.f32 %v544_v28, 0.0  ;;  %v1319_v31 = vmax.f32 %v997_v29, 0.0  ;;  %v546_v32 = vpop.f32.mrb[5].mxu0  ;;  %1852 = vmatmul.mubr.msk.f32.gmra.mrb[110].mxu0 %vm260_vm4, %v238_v27  ;;  %v2015_v33 = vpop.f32.mrb[5].mxu1  ;;  %2173 = vmatmul.mubr.msk.f32.gmra.mrb[110].mxu1 %vm260_vm4, %v238_v27  ;;  %v246_v28 = vld [vmem:[%s3056_s0 + $0x1f8] sm:$0xff] }
  0xfa   : > { %v1318_v34 = vmax.f32 %v546_v32, 0.0  ;;  %866 = vmatprep.mubr.f32.mxu0 %v2274_v1  ;;  %2175 = vmatprep.mubr.msk.f32.mxu1 %vm2275_vm0, %v2274_v1 }
  0xfb   : > { %1512 = vst [vmem:[%s2760_s4 + $0x30] sm:$0xff] %v1317_v30  ;;  %1514 = vst [vmem:[%s2760_s4 + $0x40] sm:$0xff] %v1319_v31 }
  0xfc   : > { %1513 = vst [vmem:[%s2760_s4 + $0x38] sm:$0xff] %v1318_v34  ;;  %v550_v36 = vpop.f32.mrb[6].mxu0  ;;  %v1002_v37 = vpop.f32.mrb[6].mxu1 }
  0xfd   : > { %v1320_v38 = vmax.f32 %v550_v36, 0.0  ;;  %v1322_v39 = vmax.f32 %v1002_v37, 0.0  ;;  %v552_v40 = vpop.f32.mrb[7].mxu0  ;;  %1853 = vmatmul.mubr.msk.f32.gmra.mrb[112].mxu0 %vm260_vm4, %v239_v35  ;;  %v2018_v41 = vpop.f32.mrb[7].mxu1  ;;  %2176 = vmatmul.mubr.msk.f32.gmra.mrb[112].mxu1 %vm260_vm4, %v239_v35  ;;  %v247_v36 = vld [vmem:[%s3056_s0 + $0x200] sm:$0x1] }
  0xfe   : > { %v1321_v42 = vmax.f32 %v552_v40, 0.0  ;;  %872 = vmatprep.mubr.f32.mxu0 %v2274_v1  ;;  %2178 = vmatprep.mubr.msk.f32.mxu1 %vm2275_vm0, %v2274_v1 }
  0xff   : > { %1515 = vst [vmem:[%s2760_s4 + $0x48] sm:$0xff] %v1320_v38  ;;  %1517 = vst [vmem:[%s2760_s4 + $0x58] sm:$0xff] %v1322_v39 }
 0x100   : > { %1516 = vst [vmem:[%s2760_s4 + $0x50] sm:$0xff] %v1321_v42  ;;  %v556_v44 = vpop.f32.mrb[8].mxu0  ;;  %v1007_v45 = vpop.f32.mrb[8].mxu1 }
 0x101   : > { %v1323_v46 = vmax.f32 %v556_v44, 0.0  ;;  %v1325_v47 = vmax.f32 %v1007_v45, 0.0  ;;  %v558_v48 = vpop.f32.mrb[9].mxu0  ;;  %1854 = vmatmul.mubr.msk.f32.gmra.mrb[114].mxu0 %vm260_vm4, %v240_v43  ;;  %v2021_v49 = vpop.f32.mrb[9].mxu1  ;;  %2179 = vmatmul.mubr.msk.f32.gmra.mrb[114].mxu1 %vm260_vm4, %v240_v43 }
 0x102   : > { %v1324_v50 = vmax.f32 %v558_v48, 0.0  ;;  %878 = vmatprep.mubr.f32.mxu0 %v2274_v1  ;;  %2181 = vmatprep.mubr.msk.f32.mxu1 %vm2275_vm0, %v2274_v1 }
 0x103   : > { %1518 = vst [vmem:[%s2760_s4 + $0x60] sm:$0xff] %v1323_v46  ;;  %1520 = vst [vmem:[%s2760_s4 + $0x70] sm:$0xff] %v1325_v47 }
 0x104   : > { %1519 = vst [vmem:[%s2760_s4 + $0x68] sm:$0xff] %v1324_v50  ;;  %v562_v52 = vpop.f32.mrb[10].mxu0  ;;  %v1012_v53 = vpop.f32.mrb[10].mxu1 }
 0x105   : > { %v1326_v54 = vmax.f32 %v562_v52, 0.0  ;;  %v1328_v55 = vmax.f32 %v1012_v53, 0.0  ;;  %v564_v56 = vpop.f32.mrb[11].mxu0  ;;  %1855 = vmatmul.mubr.msk.f32.gmra.mrb[116].mxu0 %vm260_vm4, %v241_v51  ;;  %v2024_v57 = vpop.f32.mrb[11].mxu1  ;;  %2182 = vmatmul.mubr.msk.f32.gmra.mrb[116].mxu1 %vm260_vm4, %v241_v51 }
 0x106   : > { %v1327_v58 = vmax.f32 %v564_v56, 0.0  ;;  %884 = vmatprep.mubr.f32.mxu0 %v2274_v1  ;;  %2184 = vmatprep.mubr.msk.f32.mxu1 %vm2275_vm0, %v2274_v1 }
 0x107   : > { %1521 = vst [vmem:[%s2760_s4 + $0x78] sm:$0xff] %v1326_v54  ;;  %1523 = vst [vmem:[%s2760_s4 + $0x88] sm:$0xff] %v1328_v55 }
 0x108   : > { %1522 = vst [vmem:[%s2760_s4 + $0x80] sm:$0xff] %v1327_v58  ;;  %v568_v60 = vpop.f32.mrb[12].mxu0  ;;  %v1017_v61 = vpop.f32.mrb[12].mxu1 }
 0x109   : > { %v1329_v62 = vmax.f32 %v568_v60, 0.0  ;;  %v1331_v63 = vmax.f32 %v1017_v61, 0.0  ;;  %v570_v0 = vpop.f32.mrb[13].mxu0  ;;  %1856 = vmatmul.mubr.msk.f32.gmra.mrb[118].mxu0 %vm260_vm4, %v242_v59  ;;  %v2027_v2 = vpop.f32.mrb[13].mxu1  ;;  %2185 = vmatmul.mubr.msk.f32.gmra.mrb[118].mxu1 %vm260_vm4, %v242_v59 }
 0x10a   : > { %v1330_v3 = vmax.f32 %v570_v0, 0.0  ;;  %890 = vmatprep.mubr.f32.mxu0 %v2274_v1  ;;  %2187 = vmatprep.mubr.msk.f32.mxu1 %vm2275_vm0, %v2274_v1 }
 0x10b   : > { %1524 = vst [vmem:[%s2760_s4 + $0x90] sm:$0xff] %v1329_v62  ;;  %1526 = vst [vmem:[%s2760_s4 + $0xa0] sm:$0xff] %v1331_v63 }
 0x10c   : > { %1525 = vst [vmem:[%s2760_s4 + $0x98] sm:$0xff] %v1330_v3  ;;  %v574_v5 = vpop.f32.mrb[14].mxu0  ;;  %v1022_v6 = vpop.f32.mrb[14].mxu1 }
 0x10d   : > { %v1332_v7 = vmax.f32 %v574_v5, 0.0  ;;  %v1334_v8 = vmax.f32 %v1022_v6, 0.0  ;;  %v576_v9 = vpop.f32.mrb[15].mxu0  ;;  %1857 = vmatmul.mubr.msk.f32.gmra.mrb[120].mxu0 %vm260_vm4, %v243_v4  ;;  %v2030_v10 = vpop.f32.mrb[15].mxu1  ;;  %2188 = vmatmul.mubr.msk.f32.gmra.mrb[120].mxu1 %vm260_vm4, %v243_v4 }
 0x10e   : > { %v1333_v11 = vmax.f32 %v576_v9, 0.0  ;;  %896 = vmatprep.mubr.f32.mxu0 %v2274_v1  ;;  %2190 = vmatprep.mubr.msk.f32.mxu1 %vm2275_vm0, %v2274_v1 }
 0x10f   : > { %1527 = vst [vmem:[%s2760_s4 + $0xa8] sm:$0xff] %v1332_v7  ;;  %1529 = vst [vmem:[%s2760_s4 + $0xb8] sm:$0xff] %v1334_v8 }
 0x110   : > { %1528 = vst [vmem:[%s2760_s4 + $0xb0] sm:$0xff] %v1333_v11  ;;  %v580_v13 = vpop.f32.mrb[16].mxu0  ;;  %v1027_v14 = vpop.f32.mrb[16].mxu1 }
 0x111   : > { %v1335_v15 = vmax.f32 %v580_v13, 0.0  ;;  %v1337_v16 = vmax.f32 %v1027_v14, 0.0  ;;  %v582_v17 = vpop.f32.mrb[17].mxu0  ;;  %1858 = vmatmul.mubr.msk.f32.gmra.mrb[122].mxu0 %vm260_vm4, %v244_v12  ;;  %v2033_v18 = vpop.f32.mrb[17].mxu1  ;;  %2191 = vmatmul.mubr.msk.f32.gmra.mrb[122].mxu1 %vm260_vm4, %v244_v12 }
 0x112   : > { %v1336_v19 = vmax.f32 %v582_v17, 0.0  ;;  %902 = vmatprep.mubr.f32.mxu0 %v2274_v1  ;;  %2193 = vmatprep.mubr.msk.f32.mxu1 %vm2275_vm0, %v2274_v1 }
 0x113   : > { %1530 = vst [vmem:[%s2760_s4 + $0xc0] sm:$0xff] %v1335_v15  ;;  %1532 = vst [vmem:[%s2760_s4 + $0xd0] sm:$0xff] %v1337_v16 }
 0x114   : > { %1531 = vst [vmem:[%s2760_s4 + $0xc8] sm:$0xff] %v1336_v19  ;;  %v586_v21 = vpop.f32.mrb[18].mxu0  ;;  %v1032_v22 = vpop.f32.mrb[18].mxu1 }
 0x115   : > { %v1338_v23 = vmax.f32 %v586_v21, 0.0  ;;  %v1340_v24 = vmax.f32 %v1032_v22, 0.0  ;;  %v588_v25 = vpop.f32.mrb[19].mxu0  ;;  %1859 = vmatmul.mubr.msk.f32.gmra.mrb[124].mxu0 %vm260_vm4, %v245_v20  ;;  %v2036_v26 = vpop.f32.mrb[19].mxu1  ;;  %2194 = vmatmul.mubr.msk.f32.gmra.mrb[124].mxu1 %vm260_vm4, %v245_v20 }
 0x116   : > { %v1339_v27 = vmax.f32 %v588_v25, 0.0  ;;  %908 = vmatprep.mubr.f32.mxu0 %v2274_v1  ;;  %2196 = vmatprep.mubr.msk.f32.mxu1 %vm2275_vm0, %v2274_v1 }
 0x117   : > { %1533 = vst [vmem:[%s2760_s4 + $0xd8] sm:$0xff] %v1338_v23  ;;  %1535 = vst [vmem:[%s2760_s4 + $0xe8] sm:$0xff] %v1340_v24 }
 0x118   : > { %1534 = vst [vmem:[%s2760_s4 + $0xe0] sm:$0xff] %v1339_v27  ;;  %v592_v29 = vpop.f32.mrb[20].mxu0  ;;  %v1037_v30 = vpop.f32.mrb[20].mxu1 }
 0x119   : > { %v1341_v31 = vmax.f32 %v592_v29, 0.0  ;;  %v1343_v32 = vmax.f32 %v1037_v30, 0.0  ;;  %v594_v33 = vpop.f32.mrb[21].mxu0  ;;  %1860 = vmatmul.mubr.msk.f32.gmra.mrb[126].mxu0 %vm260_vm4, %v246_v28  ;;  %v2039_v34 = vpop.f32.mrb[21].mxu1  ;;  %2197 = vmatmul.mubr.msk.f32.gmra.mrb[126].mxu1 %vm260_vm4, %v246_v28 }
 0x11a   : > { %v1342_v35 = vmax.f32 %v594_v33, 0.0  ;;  %914 = vmatprep.mubr.f32.mxu0 %v2274_v1  ;;  %2199 = vmatprep.mubr.msk.f32.mxu1 %vm2275_vm0, %v2274_v1 }
 0x11b   : > { %1536 = vst [vmem:[%s2760_s4 + $0xf0] sm:$0xff] %v1341_v31  ;;  %1538 = vst [vmem:[%s2760_s4 + $0x100] sm:$0xff] %v1343_v32 }
 0x11c   : > { %1537 = vst [vmem:[%s2760_s4 + $0xf8] sm:$0xff] %v1342_v35  ;;  %v598_v37 = vpop.f32.mrb[22].mxu0  ;;  %v1042_v38 = vpop.f32.mrb[22].mxu1 }
 0x11d   : > { %v1344_v39 = vmax.f32 %v598_v37, 0.0  ;;  %v1346_v40 = vmax.f32 %v1042_v38, 0.0  ;;  %v600_v41 = vpop.f32.mrb[23].mxu0  ;;  %1861 = vmatmul.mubr.msk.f32.gmra.mrb[128].mxu0 %vm260_vm4, %v247_v36  ;;  %v2042_v42 = vpop.f32.mrb[23].mxu1  ;;  %2200 = vmatmul.mubr.msk.f32.gmra.mrb[128].mxu1 %vm260_vm4, %v247_v36 }
 0x11e   : > { %v1345_v1 = vmax.f32 %v600_v41, 0.0 }
 0x11f   : > { %1539 = vst [vmem:[%s2760_s4 + $0x108] sm:$0xff] %v1344_v39  ;;  %1541 = vst [vmem:[%s2760_s4 + $0x118] sm:$0xff] %v1346_v40 }
 0x120   : > { %1540 = vst [vmem:[%s2760_s4 + $0x110] sm:$0xff] %v1345_v1  ;;  %v604_v43 = vpop.f32.mrb[24].mxu0  ;;  %v1047_v44 = vpop.f32.mrb[24].mxu1 }
 0x121   : > { %v1347_v45 = vmax.f32 %v604_v43, 0.0  ;;  %v1349_v46 = vmax.f32 %v1047_v44, 0.0  ;;  %v606_v47 = vpop.f32.mrb[25].mxu0  ;;  %v2045_v48 = vpop.f32.mrb[25].mxu1 }
 0x122   : > { %v1348_v49 = vmax.f32 %v606_v47, 0.0 }
 0x123   : > { %1542 = vst [vmem:[%s2760_s4 + $0x120] sm:$0xff] %v1347_v45  ;;  %1544 = vst [vmem:[%s2760_s4 + $0x130] sm:$0xff] %v1349_v46 }
 0x124   : > { %1543 = vst [vmem:[%s2760_s4 + $0x128] sm:$0xff] %v1348_v49  ;;  %v610_v50 = vpop.f32.mrb[26].mxu0  ;;  %v1052_v51 = vpop.f32.mrb[26].mxu1 }
 0x125   : > { %v1350_v52 = vmax.f32 %v610_v50, 0.0  ;;  %v1352_v53 = vmax.f32 %v1052_v51, 0.0  ;;  %v612_v54 = vpop.f32.mrb[27].mxu0  ;;  %v2048_v55 = vpop.f32.mrb[27].mxu1 }
 0x126   : > { %v1351_v56 = vmax.f32 %v612_v54, 0.0 }
 0x127   : > { %1545 = vst [vmem:[%s2760_s4 + $0x138] sm:$0xff] %v1350_v52  ;;  %1547 = vst [vmem:[%s2760_s4 + $0x148] sm:$0xff] %v1352_v53 }
 0x128   : > { %1546 = vst [vmem:[%s2760_s4 + $0x140] sm:$0xff] %v1351_v56  ;;  %v616_v57 = vpop.f32.mrb[28].mxu0  ;;  %v1057_v58 = vpop.f32.mrb[28].mxu1 }
 0x129   : > { %v1353_v59 = vmax.f32 %v616_v57, 0.0  ;;  %v1355_v60 = vmax.f32 %v1057_v58, 0.0  ;;  %v618_v61 = vpop.f32.mrb[29].mxu0  ;;  %v2051_v62 = vpop.f32.mrb[29].mxu1 }
 0x12a   : > { %v1354_v63 = vmax.f32 %v618_v61, 0.0 }
 0x12b   : > { %1548 = vst [vmem:[%s2760_s4 + $0x150] sm:$0xff] %v1353_v59  ;;  %1550 = vst [vmem:[%s2760_s4 + $0x160] sm:$0xff] %v1355_v60 }
 0x12c   : > { %1549 = vst [vmem:[%s2760_s4 + $0x158] sm:$0xff] %v1354_v63  ;;  %v622_v0 = vpop.f32.mrb[30].mxu0  ;;  %v1062_v2 = vpop.f32.mrb[30].mxu1 }
 0x12d   : > { %v1356_v3 = vmax.f32 %v622_v0, 0.0  ;;  %v1358_v4 = vmax.f32 %v1062_v2, 0.0  ;;  %v624_v5 = vpop.f32.mrb[31].mxu0  ;;  %v2054_v6 = vpop.f32.mrb[31].mxu1 }
 0x12e   : > { %v1357_v7 = vmax.f32 %v624_v5, 0.0 }
 0x12f   : > { %1551 = vst [vmem:[%s2760_s4 + $0x168] sm:$0xff] %v1356_v3  ;;  %1553 = vst [vmem:[%s2760_s4 + $0x178] sm:$0xff] %v1358_v4 }
 0x130   : > { %1552 = vst [vmem:[%s2760_s4 + $0x170] sm:$0xff] %v1357_v7  ;;  %v628_v8 = vpop.f32.mrb[32].mxu0  ;;  %v1067_v9 = vpop.f32.mrb[32].mxu1 }
 0x131   : > { %v1359_v10 = vmax.f32 %v628_v8, 0.0  ;;  %v1361_v11 = vmax.f32 %v1067_v9, 0.0  ;;  %v630_v12 = vpop.f32.mrb[33].mxu0  ;;  %v2057_v13 = vpop.f32.mrb[33].mxu1 }
 0x132   : > { %v1360_v14 = vmax.f32 %v630_v12, 0.0 }
 0x133   : > { %1554 = vst [vmem:[%s2760_s4 + $0x180] sm:$0xff] %v1359_v10  ;;  %1556 = vst [vmem:[%s2760_s4 + $0x190] sm:$0xff] %v1361_v11 }
 0x134   : > { %1555 = vst [vmem:[%s2760_s4 + $0x188] sm:$0xff] %v1360_v14  ;;  %v634_v15 = vpop.f32.mrb[34].mxu0  ;;  %v1072_v16 = vpop.f32.mrb[34].mxu1 }
 0x135   : > { %v1362_v17 = vmax.f32 %v634_v15, 0.0  ;;  %v1364_v18 = vmax.f32 %v1072_v16, 0.0  ;;  %v636_v19 = vpop.f32.mrb[35].mxu0  ;;  %v2060_v20 = vpop.f32.mrb[35].mxu1 }
 0x136   : > { %v1363_v21 = vmax.f32 %v636_v19, 0.0 }
 0x137   : > { %1557 = vst [vmem:[%s2760_s4 + $0x198] sm:$0xff] %v1362_v17  ;;  %1559 = vst [vmem:[%s2760_s4 + $0x1a8] sm:$0xff] %v1364_v18 }
 0x138   : > { %1558 = vst [vmem:[%s2760_s4 + $0x1a0] sm:$0xff] %v1363_v21  ;;  %v640_v22 = vpop.f32.mrb[36].mxu0  ;;  %v1077_v23 = vpop.f32.mrb[36].mxu1 }
 0x139   : > { %v1365_v24 = vmax.f32 %v640_v22, 0.0  ;;  %v1367_v25 = vmax.f32 %v1077_v23, 0.0  ;;  %v642_v26 = vpop.f32.mrb[37].mxu0  ;;  %v2063_v27 = vpop.f32.mrb[37].mxu1 }
 0x13a   : > { %v1366_v28 = vmax.f32 %v642_v26, 0.0 }
 0x13b   : > { %1560 = vst [vmem:[%s2760_s4 + $0x1b0] sm:$0xff] %v1365_v24  ;;  %1562 = vst [vmem:[%s2760_s4 + $0x1c0] sm:$0xff] %v1367_v25 }
 0x13c   : > { %1561 = vst [vmem:[%s2760_s4 + $0x1b8] sm:$0xff] %v1366_v28  ;;  %v646_v29 = vpop.f32.mrb[38].mxu0  ;;  %v1082_v30 = vpop.f32.mrb[38].mxu1 }
 0x13d   : > { %v1368_v31 = vmax.f32 %v646_v29, 0.0  ;;  %v1370_v32 = vmax.f32 %v1082_v30, 0.0  ;;  %v648_v33 = vpop.f32.mrb[39].mxu0  ;;  %v2066_v34 = vpop.f32.mrb[39].mxu1 }
 0x13e   : > { %v1369_v35 = vmax.f32 %v648_v33, 0.0 }
 0x13f   : > { %1563 = vst [vmem:[%s2760_s4 + $0x1c8] sm:$0xff] %v1368_v31  ;;  %1565 = vst [vmem:[%s2760_s4 + $0x1d8] sm:$0xff] %v1370_v32 }
 0x140   : > { %1564 = vst [vmem:[%s2760_s4 + $0x1d0] sm:$0xff] %v1369_v35  ;;  %v652_v36 = vpop.f32.mrb[40].mxu0  ;;  %v1087_v37 = vpop.f32.mrb[40].mxu1 }
 0x141   : > { %v1371_v38 = vmax.f32 %v652_v36, 0.0  ;;  %v1373_v39 = vmax.f32 %v1087_v37, 0.0  ;;  %v654_v40 = vpop.f32.mrb[41].mxu0  ;;  %v2069_v41 = vpop.f32.mrb[41].mxu1 }
 0x142   : > { %v1372_v42 = vmax.f32 %v654_v40, 0.0 }
 0x143   : > { %1566 = vst [vmem:[%s2760_s4 + $0x1e0] sm:$0xff] %v1371_v38  ;;  %1568 = vst [vmem:[%s2760_s4 + $0x1f0] sm:$0xff] %v1373_v39 }
 0x144   : > { %1567 = vst [vmem:[%s2760_s4 + $0x1e8] sm:$0xff] %v1372_v42  ;;  %v658_v1 = vpop.f32.mrb[42].mxu0  ;;  %v1092_v43 = vpop.f32.mrb[42].mxu1 }
 0x145   : > { %v1374_v44 = vmax.f32 %v658_v1, 0.0  ;;  %v1376_v45 = vmax.f32 %v1092_v43, 0.0  ;;  %v660_v46 = vpop.f32.mrb[43].mxu0  ;;  %v2072_v47 = vpop.f32.mrb[43].mxu1 }
 0x146   : > { %v1375_v48 = vmax.f32 %v660_v46, 0.0 }
 0x147   : > { %1569 = vst [vmem:[%s2760_s4 + $0x1f8] sm:$0xff] %v1374_v44  ;;  %1571 = vst [vmem:[%s2760_s4 + $0x208] sm:$0xff] %v1376_v45 }
 0x148   : > { %1570 = vst [vmem:[%s2760_s4 + $0x200] sm:$0xff] %v1375_v48  ;;  %v664_v49 = vpop.f32.mrb[44].mxu0  ;;  %v1097_v50 = vpop.f32.mrb[44].mxu1 }
 0x149   : > { %v1377_v51 = vmax.f32 %v664_v49, 0.0  ;;  %v1379_v52 = vmax.f32 %v1097_v50, 0.0  ;;  %v666_v53 = vpop.f32.mrb[45].mxu0  ;;  %v2075_v54 = vpop.f32.mrb[45].mxu1 }
 0x14a   : > { %v1378_v55 = vmax.f32 %v666_v53, 0.0 }
 0x14b   : > { %1572 = vst [vmem:[%s2760_s4 + $0x210] sm:$0xff] %v1377_v51  ;;  %1574 = vst [vmem:[%s2760_s4 + $0x220] sm:$0xff] %v1379_v52 }
 0x14c   : > { %1573 = vst [vmem:[%s2760_s4 + $0x218] sm:$0xff] %v1378_v55  ;;  %v670_v56 = vpop.f32.mrb[46].mxu0  ;;  %v1102_v57 = vpop.f32.mrb[46].mxu1 }
 0x14d   : > { %v1380_v58 = vmax.f32 %v670_v56, 0.0  ;;  %v1382_v59 = vmax.f32 %v1102_v57, 0.0  ;;  %v672_v60 = vpop.f32.mrb[47].mxu0  ;;  %v2078_v61 = vpop.f32.mrb[47].mxu1 }
 0x14e   : > { %v1381_v62 = vmax.f32 %v672_v60, 0.0 }
 0x14f   : > { %1575 = vst [vmem:[%s2760_s4 + $0x228] sm:$0xff] %v1380_v58  ;;  %1577 = vst [vmem:[%s2760_s4 + $0x238] sm:$0xff] %v1382_v59 }
 0x150   : > { %1576 = vst [vmem:[%s2760_s4 + $0x230] sm:$0xff] %v1381_v62  ;;  %v676_v63 = vpop.f32.mrb[48].mxu0  ;;  %v1107_v0 = vpop.f32.mrb[48].mxu1 }
 0x151   : > { %v1383_v2 = vmax.f32 %v676_v63, 0.0  ;;  %v1385_v3 = vmax.f32 %v1107_v0, 0.0  ;;  %v678_v4 = vpop.f32.mrb[49].mxu0  ;;  %v2081_v5 = vpop.f32.mrb[49].mxu1 }
 0x152   : > { %v1384_v6 = vmax.f32 %v678_v4, 0.0 }
 0x153   : > { %1578 = vst [vmem:[%s2760_s4 + $0x240] sm:$0xff] %v1383_v2  ;;  %1580 = vst [vmem:[%s2760_s4 + $0x250] sm:$0xff] %v1385_v3 }
 0x154   : > { %1579 = vst [vmem:[%s2760_s4 + $0x248] sm:$0xff] %v1384_v6  ;;  %v682_v7 = vpop.f32.mrb[50].mxu0  ;;  %v1112_v8 = vpop.f32.mrb[50].mxu1 }
 0x155   : > { %v1386_v9 = vmax.f32 %v682_v7, 0.0  ;;  %v1388_v10 = vmax.f32 %v1112_v8, 0.0  ;;  %v684_v11 = vpop.f32.mrb[51].mxu0  ;;  %v2084_v12 = vpop.f32.mrb[51].mxu1 }
 0x156   : > { %v1387_v13 = vmax.f32 %v684_v11, 0.0 }
 0x157   : > { %1581 = vst [vmem:[%s2760_s4 + $0x258] sm:$0xff] %v1386_v9  ;;  %1583 = vst [vmem:[%s2760_s4 + $0x268] sm:$0xff] %v1388_v10 }
 0x158   : > { %1582 = vst [vmem:[%s2760_s4 + $0x260] sm:$0xff] %v1387_v13  ;;  %v688_v14 = vpop.f32.mrb[52].mxu0  ;;  %v1117_v15 = vpop.f32.mrb[52].mxu1 }
 0x159   : > { %v1389_v16 = vmax.f32 %v688_v14, 0.0  ;;  %v1391_v17 = vmax.f32 %v1117_v15, 0.0  ;;  %v690_v18 = vpop.f32.mrb[53].mxu0  ;;  %v2087_v19 = vpop.f32.mrb[53].mxu1 }
 0x15a   : > { %v1390_v20 = vmax.f32 %v690_v18, 0.0 }
 0x15b   : > { %1584 = vst [vmem:[%s2760_s4 + $0x270] sm:$0xff] %v1389_v16  ;;  %1586 = vst [vmem:[%s2760_s4 + $0x280] sm:$0xff] %v1391_v17 }
 0x15c   : > { %1585 = vst [vmem:[%s2760_s4 + $0x278] sm:$0xff] %v1390_v20  ;;  %v694_v21 = vpop.f32.mrb[54].mxu0  ;;  %v1122_v22 = vpop.f32.mrb[54].mxu1 }
 0x15d   : > { %v1392_v23 = vmax.f32 %v694_v21, 0.0  ;;  %v1394_v24 = vmax.f32 %v1122_v22, 0.0  ;;  %v696_v25 = vpop.f32.mrb[55].mxu0  ;;  %v2090_v26 = vpop.f32.mrb[55].mxu1 }
 0x15e   : > { %v1393_v27 = vmax.f32 %v696_v25, 0.0 }
 0x15f   : > { %1587 = vst [vmem:[%s2760_s4 + $0x288] sm:$0xff] %v1392_v23  ;;  %1589 = vst [vmem:[%s2760_s4 + $0x298] sm:$0xff] %v1394_v24 }
 0x160   : > { %1588 = vst [vmem:[%s2760_s4 + $0x290] sm:$0xff] %v1393_v27  ;;  %v700_v28 = vpop.f32.mrb[56].mxu0  ;;  %v1127_v29 = vpop.f32.mrb[56].mxu1 }
 0x161   : > { %v1395_v30 = vmax.f32 %v700_v28, 0.0  ;;  %v1397_v31 = vmax.f32 %v1127_v29, 0.0  ;;  %v702_v32 = vpop.f32.mrb[57].mxu0  ;;  %v2093_v33 = vpop.f32.mrb[57].mxu1 }
 0x162   : > { %v1396_v34 = vmax.f32 %v702_v32, 0.0 }
 0x163   : > { %1590 = vst [vmem:[%s2760_s4 + $0x2a0] sm:$0xff] %v1395_v30  ;;  %1592 = vst [vmem:[%s2760_s4 + $0x2b0] sm:$0xff] %v1397_v31 }
 0x164   : > { %1591 = vst [vmem:[%s2760_s4 + $0x2a8] sm:$0xff] %v1396_v34  ;;  %v706_v35 = vpop.f32.mrb[58].mxu0  ;;  %v1132_v36 = vpop.f32.mrb[58].mxu1 }
 0x165   : > { %v1398_v37 = vmax.f32 %v706_v35, 0.0  ;;  %v1400_v38 = vmax.f32 %v1132_v36, 0.0  ;;  %v708_v39 = vpop.f32.mrb[59].mxu0  ;;  %v2096_v40 = vpop.f32.mrb[59].mxu1 }
 0x166   : > { %v1399_v41 = vmax.f32 %v708_v39, 0.0 }
 0x167   : > { %1593 = vst [vmem:[%s2760_s4 + $0x2b8] sm:$0xff] %v1398_v37  ;;  %1595 = vst [vmem:[%s2760_s4 + $0x2c8] sm:$0xff] %v1400_v38 }
 0x168   : > { %1594 = vst [vmem:[%s2760_s4 + $0x2c0] sm:$0xff] %v1399_v41  ;;  %v712_v42 = vpop.f32.mrb[60].mxu0  ;;  %v1137_v1 = vpop.f32.mrb[60].mxu1 }
 0x169   : > { %v1401_v43 = vmax.f32 %v712_v42, 0.0  ;;  %v1403_v44 = vmax.f32 %v1137_v1, 0.0  ;;  %v714_v45 = vpop.f32.mrb[61].mxu0  ;;  %v2099_v46 = vpop.f32.mrb[61].mxu1 }
 0x16a   : > { %v1402_v47 = vmax.f32 %v714_v45, 0.0 }
 0x16b   : > { %1596 = vst [vmem:[%s2760_s4 + $0x2d0] sm:$0xff] %v1401_v43  ;;  %1598 = vst [vmem:[%s2760_s4 + $0x2e0] sm:$0xff] %v1403_v44 }
 0x16c   : > { %1597 = vst [vmem:[%s2760_s4 + $0x2d8] sm:$0xff] %v1402_v47  ;;  %v718_v48 = vpop.f32.mrb[62].mxu0  ;;  %v1142_v49 = vpop.f32.mrb[62].mxu1 }
 0x16d   : > { %v1404_v50 = vmax.f32 %v718_v48, 0.0  ;;  %v1406_v51 = vmax.f32 %v1142_v49, 0.0  ;;  %v720_v52 = vpop.f32.mrb[63].mxu0  ;;  %v2102_v53 = vpop.f32.mrb[63].mxu1 }
 0x16e   : > { %v1405_v54 = vmax.f32 %v720_v52, 0.0 }
 0x16f   : > { %1599 = vst [vmem:[%s2760_s4 + $0x2e8] sm:$0xff] %v1404_v50  ;;  %1601 = vst [vmem:[%s2760_s4 + $0x2f8] sm:$0xff] %v1406_v51 }
 0x170   : > { %1600 = vst [vmem:[%s2760_s4 + $0x2f0] sm:$0xff] %v1405_v54  ;;  %v724_v55 = vpop.f32.mrb[64].mxu0  ;;  %v1147_v56 = vpop.f32.mrb[64].mxu1 }
 0x171   : > { %v1407_v57 = vmax.f32 %v724_v55, 0.0  ;;  %v1409_v58 = vmax.f32 %v1147_v56, 0.0  ;;  %v726_v59 = vpop.f32.mrb[65].mxu0  ;;  %v2105_v60 = vpop.f32.mrb[65].mxu1 }
 0x172   : > { %v1408_v61 = vmax.f32 %v726_v59, 0.0 }
 0x173   : > { %1602 = vst [vmem:[%s2760_s4 + $0x300] sm:$0xff] %v1407_v57  ;;  %1604 = vst [vmem:[%s2760_s4 + $0x310] sm:$0xff] %v1409_v58 }
 0x174   : > { %1603 = vst [vmem:[%s2760_s4 + $0x308] sm:$0xff] %v1408_v61  ;;  %v730_v62 = vpop.f32.mrb[66].mxu0  ;;  %v1152_v63 = vpop.f32.mrb[66].mxu1 }
 0x175   : > { %v1410_v0 = vmax.f32 %v730_v62, 0.0  ;;  %v1412_v2 = vmax.f32 %v1152_v63, 0.0  ;;  %v732_v3 = vpop.f32.mrb[67].mxu0  ;;  %v2108_v4 = vpop.f32.mrb[67].mxu1 }
 0x176   : > { %v1411_v5 = vmax.f32 %v732_v3, 0.0 }
 0x177   : > { %1605 = vst [vmem:[%s2760_s4 + $0x318] sm:$0xff] %v1410_v0  ;;  %1607 = vst [vmem:[%s2760_s4 + $0x328] sm:$0xff] %v1412_v2 }
 0x178   : > { %1606 = vst [vmem:[%s2760_s4 + $0x320] sm:$0xff] %v1411_v5  ;;  %v736_v6 = vpop.f32.mrb[68].mxu0  ;;  %v1157_v7 = vpop.f32.mrb[68].mxu1 }
 0x179   : > { %v1413_v8 = vmax.f32 %v736_v6, 0.0  ;;  %v1415_v9 = vmax.f32 %v1157_v7, 0.0  ;;  %v738_v10 = vpop.f32.mrb[69].mxu0  ;;  %v2111_v11 = vpop.f32.mrb[69].mxu1 }
 0x17a   : > { %v1414_v12 = vmax.f32 %v738_v10, 0.0 }
 0x17b   : > { %1608 = vst [vmem:[%s2760_s4 + $0x330] sm:$0xff] %v1413_v8  ;;  %1610 = vst [vmem:[%s2760_s4 + $0x340] sm:$0xff] %v1415_v9 }
 0x17c   : > { %1609 = vst [vmem:[%s2760_s4 + $0x338] sm:$0xff] %v1414_v12  ;;  %v742_v13 = vpop.f32.mrb[70].mxu0  ;;  %v1162_v14 = vpop.f32.mrb[70].mxu1 }
 0x17d   : > { %v1416_v15 = vmax.f32 %v742_v13, 0.0  ;;  %v1418_v16 = vmax.f32 %v1162_v14, 0.0  ;;  %v744_v17 = vpop.f32.mrb[71].mxu0  ;;  %v2114_v18 = vpop.f32.mrb[71].mxu1 }
 0x17e   : > { %v1417_v19 = vmax.f32 %v744_v17, 0.0 }
 0x17f   : > { %1611 = vst [vmem:[%s2760_s4 + $0x348] sm:$0xff] %v1416_v15  ;;  %1613 = vst [vmem:[%s2760_s4 + $0x358] sm:$0xff] %v1418_v16 }
 0x180   : > { %1612 = vst [vmem:[%s2760_s4 + $0x350] sm:$0xff] %v1417_v19  ;;  %v748_v20 = vpop.f32.mrb[72].mxu0  ;;  %v1167_v21 = vpop.f32.mrb[72].mxu1 }
 0x181   : > { %v1419_v22 = vmax.f32 %v748_v20, 0.0  ;;  %v1421_v23 = vmax.f32 %v1167_v21, 0.0  ;;  %v750_v24 = vpop.f32.mrb[73].mxu0  ;;  %v2117_v25 = vpop.f32.mrb[73].mxu1 }
 0x182   : > { %v1420_v26 = vmax.f32 %v750_v24, 0.0 }
 0x183   : > { %1614 = vst [vmem:[%s2760_s4 + $0x360] sm:$0xff] %v1419_v22  ;;  %1616 = vst [vmem:[%s2760_s4 + $0x370] sm:$0xff] %v1421_v23 }
 0x184   : > { %1615 = vst [vmem:[%s2760_s4 + $0x368] sm:$0xff] %v1420_v26  ;;  %v754_v27 = vpop.f32.mrb[74].mxu0  ;;  %v1172_v28 = vpop.f32.mrb[74].mxu1 }
 0x185   : > { %v1422_v29 = vmax.f32 %v754_v27, 0.0  ;;  %v1424_v30 = vmax.f32 %v1172_v28, 0.0  ;;  %v756_v31 = vpop.f32.mrb[75].mxu0  ;;  %v2120_v32 = vpop.f32.mrb[75].mxu1 }
 0x186   : > { %v1423_v33 = vmax.f32 %v756_v31, 0.0 }
 0x187   : > { %1617 = vst [vmem:[%s2760_s4 + $0x378] sm:$0xff] %v1422_v29  ;;  %1619 = vst [vmem:[%s2760_s4 + $0x388] sm:$0xff] %v1424_v30 }
 0x188   : > { %1618 = vst [vmem:[%s2760_s4 + $0x380] sm:$0xff] %v1423_v33  ;;  %v760_v34 = vpop.f32.mrb[76].mxu0  ;;  %v1177_v35 = vpop.f32.mrb[76].mxu1 }
 0x189   : > { %v1425_v36 = vmax.f32 %v760_v34, 0.0  ;;  %v1427_v37 = vmax.f32 %v1177_v35, 0.0  ;;  %v762_v38 = vpop.f32.mrb[77].mxu0  ;;  %v2123_v39 = vpop.f32.mrb[77].mxu1 }
 0x18a   : > { %v1426_v40 = vmax.f32 %v762_v38, 0.0 }
 0x18b   : > { %1620 = vst [vmem:[%s2760_s4 + $0x390] sm:$0xff] %v1425_v36  ;;  %1622 = vst [vmem:[%s2760_s4 + $0x3a0] sm:$0xff] %v1427_v37 }
 0x18c   : > { %1621 = vst [vmem:[%s2760_s4 + $0x398] sm:$0xff] %v1426_v40  ;;  %v766_v41 = vpop.f32.mrb[78].mxu0  ;;  %v1182_v42 = vpop.f32.mrb[78].mxu1 }
 0x18d   : > { %v1428_v1 = vmax.f32 %v766_v41, 0.0  ;;  %v1430_v43 = vmax.f32 %v1182_v42, 0.0  ;;  %v768_v44 = vpop.f32.mrb[79].mxu0  ;;  %v2126_v45 = vpop.f32.mrb[79].mxu1 }
 0x18e   : > { %v1429_v46 = vmax.f32 %v768_v44, 0.0 }
 0x18f   : > { %1623 = vst [vmem:[%s2760_s4 + $0x3a8] sm:$0xff] %v1428_v1  ;;  %1625 = vst [vmem:[%s2760_s4 + $0x3b8] sm:$0xff] %v1430_v43 }
 0x190   : > { %1624 = vst [vmem:[%s2760_s4 + $0x3b0] sm:$0xff] %v1429_v46  ;;  %v772_v47 = vpop.f32.mrb[80].mxu0  ;;  %v1187_v48 = vpop.f32.mrb[80].mxu1 }
 0x191   : > { %v1431_v49 = vmax.f32 %v772_v47, 0.0  ;;  %v1433_v50 = vmax.f32 %v1187_v48, 0.0  ;;  %v774_v51 = vpop.f32.mrb[81].mxu0  ;;  %v2129_v52 = vpop.f32.mrb[81].mxu1 }
 0x192   : > { %v1432_v53 = vmax.f32 %v774_v51, 0.0 }
 0x193   : > { %1626 = vst [vmem:[%s2760_s4 + $0x3c0] sm:$0xff] %v1431_v49  ;;  %1628 = vst [vmem:[%s2760_s4 + $0x3d0] sm:$0xff] %v1433_v50 }
 0x194   : > { %1627 = vst [vmem:[%s2760_s4 + $0x3c8] sm:$0xff] %v1432_v53  ;;  %v778_v54 = vpop.f32.mrb[82].mxu0  ;;  %v1192_v55 = vpop.f32.mrb[82].mxu1 }
 0x195   : > { %v1434_v56 = vmax.f32 %v778_v54, 0.0  ;;  %v1436_v57 = vmax.f32 %v1192_v55, 0.0  ;;  %v780_v58 = vpop.f32.mrb[83].mxu0  ;;  %v2132_v59 = vpop.f32.mrb[83].mxu1 }
 0x196   : > { %v1435_v60 = vmax.f32 %v780_v58, 0.0 }
 0x197   : > { %1629 = vst [vmem:[%s2760_s4 + $0x3d8] sm:$0xff] %v1434_v56  ;;  %1631 = vst [vmem:[%s2760_s4 + $0x3e8] sm:$0xff] %v1436_v57 }
 0x198   : > { %1630 = vst [vmem:[%s2760_s4 + $0x3e0] sm:$0xff] %v1435_v60  ;;  %v784_v61 = vpop.f32.mrb[84].mxu0  ;;  %v1197_v62 = vpop.f32.mrb[84].mxu1 }
 0x199   : > { %v1437_v63 = vmax.f32 %v784_v61, 0.0  ;;  %v1439_v0 = vmax.f32 %v1197_v62, 0.0  ;;  %v786_v2 = vpop.f32.mrb[85].mxu0  ;;  %v2135_v3 = vpop.f32.mrb[85].mxu1 }
 0x19a   : > { %v1438_v4 = vmax.f32 %v786_v2, 0.0 }
 0x19b   : > { %1632 = vst [vmem:[%s2760_s4 + $0x3f0] sm:$0xff] %v1437_v63  ;;  %1634 = vst [vmem:[%s2760_s4 + $0x400] sm:$0xff] %v1439_v0 }
 0x19c   : > { %1633 = vst [vmem:[%s2760_s4 + $0x3f8] sm:$0xff] %v1438_v4  ;;  %v790_v5 = vpop.f32.mrb[86].mxu0  ;;  %v1202_v6 = vpop.f32.mrb[86].mxu1 }
 0x19d   : > { %v1440_v7 = vmax.f32 %v790_v5, 0.0  ;;  %v1442_v8 = vmax.f32 %v1202_v6, 0.0  ;;  %v792_v9 = vpop.f32.mrb[87].mxu0  ;;  %v2138_v10 = vpop.f32.mrb[87].mxu1 }
 0x19e   : > { %v1441_v11 = vmax.f32 %v792_v9, 0.0 }
 0x19f   : > { %1635 = vst [vmem:[%s2760_s4 + $0x408] sm:$0xff] %v1440_v7  ;;  %1637 = vst [vmem:[%s2760_s4 + $0x418] sm:$0xff] %v1442_v8 }
 0x1a0   : > { %1636 = vst [vmem:[%s2760_s4 + $0x410] sm:$0xff] %v1441_v11  ;;  %v796_v12 = vpop.f32.mrb[88].mxu0  ;;  %v1207_v13 = vpop.f32.mrb[88].mxu1 }
 0x1a1   : > { %v1443_v14 = vmax.f32 %v796_v12, 0.0  ;;  %v1445_v15 = vmax.f32 %v1207_v13, 0.0  ;;  %v798_v16 = vpop.f32.mrb[89].mxu0  ;;  %v2141_v17 = vpop.f32.mrb[89].mxu1 }
 0x1a2   : > { %v1444_v18 = vmax.f32 %v798_v16, 0.0 }
 0x1a3   : > { %1638 = vst [vmem:[%s2760_s4 + $0x420] sm:$0xff] %v1443_v14  ;;  %1640 = vst [vmem:[%s2760_s4 + $0x430] sm:$0xff] %v1445_v15 }
 0x1a4   : > { %1639 = vst [vmem:[%s2760_s4 + $0x428] sm:$0xff] %v1444_v18  ;;  %v802_v19 = vpop.f32.mrb[90].mxu0  ;;  %v1212_v20 = vpop.f32.mrb[90].mxu1 }
 0x1a5   : > { %v1446_v21 = vmax.f32 %v802_v19, 0.0  ;;  %v1448_v22 = vmax.f32 %v1212_v20, 0.0  ;;  %v804_v23 = vpop.f32.mrb[91].mxu0  ;;  %v2144_v24 = vpop.f32.mrb[91].mxu1 }
 0x1a6   : > { %v1447_v25 = vmax.f32 %v804_v23, 0.0 }
 0x1a7   : > { %1641 = vst [vmem:[%s2760_s4 + $0x438] sm:$0xff] %v1446_v21  ;;  %1643 = vst [vmem:[%s2760_s4 + $0x448] sm:$0xff] %v1448_v22 }
 0x1a8   : > { %1642 = vst [vmem:[%s2760_s4 + $0x440] sm:$0xff] %v1447_v25  ;;  %v808_v26 = vpop.f32.mrb[92].mxu0  ;;  %v1217_v27 = vpop.f32.mrb[92].mxu1 }
 0x1a9   : > { %v1449_v28 = vmax.f32 %v808_v26, 0.0  ;;  %v1451_v29 = vmax.f32 %v1217_v27, 0.0  ;;  %v810_v30 = vpop.f32.mrb[93].mxu0  ;;  %v2147_v31 = vpop.f32.mrb[93].mxu1 }
 0x1aa   : > { %v1450_v32 = vmax.f32 %v810_v30, 0.0 }
 0x1ab   : > { %1644 = vst [vmem:[%s2760_s4 + $0x450] sm:$0xff] %v1449_v28  ;;  %1646 = vst [vmem:[%s2760_s4 + $0x460] sm:$0xff] %v1451_v29 }
 0x1ac   : > { %1645 = vst [vmem:[%s2760_s4 + $0x458] sm:$0xff] %v1450_v32  ;;  %v814_v33 = vpop.f32.mrb[94].mxu0  ;;  %v1222_v34 = vpop.f32.mrb[94].mxu1 }
 0x1ad   : > { %v1452_v35 = vmax.f32 %v814_v33, 0.0  ;;  %v1454_v36 = vmax.f32 %v1222_v34, 0.0  ;;  %v816_v37 = vpop.f32.mrb[95].mxu0  ;;  %v2150_v38 = vpop.f32.mrb[95].mxu1 }
 0x1ae   : > { %v1453_v39 = vmax.f32 %v816_v37, 0.0 }
 0x1af   : > { %1647 = vst [vmem:[%s2760_s4 + $0x468] sm:$0xff] %v1452_v35  ;;  %1649 = vst [vmem:[%s2760_s4 + $0x478] sm:$0xff] %v1454_v36 }
 0x1b0   : > { %1648 = vst [vmem:[%s2760_s4 + $0x470] sm:$0xff] %v1453_v39  ;;  %v820_v40 = vpop.f32.mrb[96].mxu0  ;;  %v1227_v41 = vpop.f32.mrb[96].mxu1 }
 0x1b1   : > { %v1455_v42 = vmax.f32 %v820_v40, 0.0  ;;  %v1457_v1 = vmax.f32 %v1227_v41, 0.0  ;;  %v822_v43 = vpop.f32.mrb[97].mxu0  ;;  %v2153_v44 = vpop.f32.mrb[97].mxu1 }
 0x1b2   : > { %v1456_v45 = vmax.f32 %v822_v43, 0.0 }
 0x1b3   : > { %1650 = vst [vmem:[%s2760_s4 + $0x480] sm:$0xff] %v1455_v42  ;;  %1652 = vst [vmem:[%s2760_s4 + $0x490] sm:$0xff] %v1457_v1 }
 0x1b4   : > { %1651 = vst [vmem:[%s2760_s4 + $0x488] sm:$0xff] %v1456_v45  ;;  %v826_v46 = vpop.f32.mrb[98].mxu0  ;;  %v1232_v47 = vpop.f32.mrb[98].mxu1 }
 0x1b5   : > { %v1458_v48 = vmax.f32 %v826_v46, 0.0  ;;  %v1460_v49 = vmax.f32 %v1232_v47, 0.0  ;;  %v828_v50 = vpop.f32.mrb[99].mxu0  ;;  %v2156_v51 = vpop.f32.mrb[99].mxu1 }
 0x1b6   : > { %v1459_v52 = vmax.f32 %v828_v50, 0.0 }
 0x1b7   : > { %1653 = vst [vmem:[%s2760_s4 + $0x498] sm:$0xff] %v1458_v48  ;;  %1655 = vst [vmem:[%s2760_s4 + $0x4a8] sm:$0xff] %v1460_v49 }
 0x1b8   : > { %1654 = vst [vmem:[%s2760_s4 + $0x4a0] sm:$0xff] %v1459_v52  ;;  %v832_v53 = vpop.f32.mrb[100].mxu0  ;;  %v1237_v54 = vpop.f32.mrb[100].mxu1 }
 0x1b9   : > { %v1461_v55 = vmax.f32 %v832_v53, 0.0  ;;  %v1463_v56 = vmax.f32 %v1237_v54, 0.0  ;;  %v834_v57 = vpop.f32.mrb[101].mxu0  ;;  %v2159_v58 = vpop.f32.mrb[101].mxu1 }
 0x1ba   : > { %v1462_v59 = vmax.f32 %v834_v57, 0.0 }
 0x1bb   : > { %1656 = vst [vmem:[%s2760_s4 + $0x4b0] sm:$0xff] %v1461_v55  ;;  %1658 = vst [vmem:[%s2760_s4 + $0x4c0] sm:$0xff] %v1463_v56 }
 0x1bc   : > { %1657 = vst [vmem:[%s2760_s4 + $0x4b8] sm:$0xff] %v1462_v59  ;;  %v838_v60 = vpop.f32.mrb[102].mxu0  ;;  %v1242_v61 = vpop.f32.mrb[102].mxu1 }
 0x1bd   : > { %v1464_v62 = vmax.f32 %v838_v60, 0.0  ;;  %v1466_v63 = vmax.f32 %v1242_v61, 0.0  ;;  %v840_v0 = vpop.f32.mrb[103].mxu0  ;;  %v2162_v2 = vpop.f32.mrb[103].mxu1 }
 0x1be   : > { %v1465_v3 = vmax.f32 %v840_v0, 0.0 }
 0x1bf   : > { %1659 = vst [vmem:[%s2760_s4 + $0x4c8] sm:$0xff] %v1464_v62  ;;  %1661 = vst [vmem:[%s2760_s4 + $0x4d8] sm:$0xff] %v1466_v63 }
 0x1c0   : > { %1660 = vst [vmem:[%s2760_s4 + $0x4d0] sm:$0xff] %v1465_v3  ;;  %v844_v4 = vpop.f32.mrb[104].mxu0  ;;  %v1247_v5 = vpop.f32.mrb[104].mxu1 }
 0x1c1   : > { %v1467_v6 = vmax.f32 %v844_v4, 0.0  ;;  %v1469_v7 = vmax.f32 %v1247_v5, 0.0  ;;  %v846_v8 = vpop.f32.mrb[105].mxu0  ;;  %v2165_v9 = vpop.f32.mrb[105].mxu1 }
 0x1c2   : > { %v1468_v10 = vmax.f32 %v846_v8, 0.0 }
 0x1c3   : > { %1662 = vst [vmem:[%s2760_s4 + $0x4e0] sm:$0xff] %v1467_v6  ;;  %1664 = vst [vmem:[%s2760_s4 + $0x4f0] sm:$0xff] %v1469_v7 }
 0x1c4   : > { %1663 = vst [vmem:[%s2760_s4 + $0x4e8] sm:$0xff] %v1468_v10  ;;  %v850_v11 = vpop.f32.mrb[106].mxu0  ;;  %v1252_v12 = vpop.f32.mrb[106].mxu1 }
 0x1c5   : > { %v1470_v13 = vmax.f32 %v850_v11, 0.0  ;;  %v1472_v14 = vmax.f32 %v1252_v12, 0.0  ;;  %v852_v15 = vpop.f32.mrb[107].mxu0  ;;  %v2168_v16 = vpop.f32.mrb[107].mxu1 }
 0x1c6   : > { %v1471_v17 = vmax.f32 %v852_v15, 0.0 }
 0x1c7   : > { %1665 = vst [vmem:[%s2760_s4 + $0x4f8] sm:$0xff] %v1470_v13  ;;  %1667 = vst [vmem:[%s2760_s4 + $0x508] sm:$0xff] %v1472_v14 }
 0x1c8   : > { %1666 = vst [vmem:[%s2760_s4 + $0x500] sm:$0xff] %v1471_v17  ;;  %v856_v18 = vpop.f32.mrb[108].mxu0  ;;  %v1257_v19 = vpop.f32.mrb[108].mxu1 }
 0x1c9   : > { %v1473_v20 = vmax.f32 %v856_v18, 0.0  ;;  %v1475_v21 = vmax.f32 %v1257_v19, 0.0  ;;  %v858_v22 = vpop.f32.mrb[109].mxu0  ;;  %v2171_v23 = vpop.f32.mrb[109].mxu1 }
 0x1ca   : > { %v1474_v24 = vmax.f32 %v858_v22, 0.0 }
 0x1cb   : > { %1668 = vst [vmem:[%s2760_s4 + $0x510] sm:$0xff] %v1473_v20  ;;  %1670 = vst [vmem:[%s2760_s4 + $0x520] sm:$0xff] %v1475_v21 }
 0x1cc   : > { %1669 = vst [vmem:[%s2760_s4 + $0x518] sm:$0xff] %v1474_v24  ;;  %v862_v25 = vpop.f32.mrb[110].mxu0  ;;  %v1262_v26 = vpop.f32.mrb[110].mxu1 }
 0x1cd   : > { %v1476_v27 = vmax.f32 %v862_v25, 0.0  ;;  %v1478_v28 = vmax.f32 %v1262_v26, 0.0  ;;  %v864_v29 = vpop.f32.mrb[111].mxu0  ;;  %v2174_v30 = vpop.f32.mrb[111].mxu1 }
 0x1ce   : > { %v1477_v31 = vmax.f32 %v864_v29, 0.0 }
 0x1cf   : > { %1671 = vst [vmem:[%s2760_s4 + $0x528] sm:$0xff] %v1476_v27  ;;  %1673 = vst [vmem:[%s2760_s4 + $0x538] sm:$0xff] %v1478_v28 }
 0x1d0   : > { %1672 = vst [vmem:[%s2760_s4 + $0x530] sm:$0xff] %v1477_v31  ;;  %v868_v32 = vpop.f32.mrb[112].mxu0  ;;  %v1267_v33 = vpop.f32.mrb[112].mxu1 }
 0x1d1   : > { %v1479_v34 = vmax.f32 %v868_v32, 0.0  ;;  %v1481_v35 = vmax.f32 %v1267_v33, 0.0  ;;  %v870_v36 = vpop.f32.mrb[113].mxu0  ;;  %v2177_v37 = vpop.f32.mrb[113].mxu1 }
 0x1d2   : > { %v1480_v38 = vmax.f32 %v870_v36, 0.0 }
 0x1d3   : > { %1674 = vst [vmem:[%s2760_s4 + $0x540] sm:$0xff] %v1479_v34  ;;  %1676 = vst [vmem:[%s2760_s4 + $0x550] sm:$0xff] %v1481_v35 }
 0x1d4   : > { %1675 = vst [vmem:[%s2760_s4 + $0x548] sm:$0xff] %v1480_v38  ;;  %v874_v39 = vpop.f32.mrb[114].mxu0  ;;  %v1272_v40 = vpop.f32.mrb[114].mxu1 }
 0x1d5   : > { %v1482_v41 = vmax.f32 %v874_v39, 0.0  ;;  %v1484_v42 = vmax.f32 %v1272_v40, 0.0  ;;  %v876_v1 = vpop.f32.mrb[115].mxu0  ;;  %v2180_v43 = vpop.f32.mrb[115].mxu1 }
 0x1d6   : > { %v1483_v44 = vmax.f32 %v876_v1, 0.0 }
 0x1d7   : > { %1677 = vst [vmem:[%s2760_s4 + $0x558] sm:$0xff] %v1482_v41  ;;  %1679 = vst [vmem:[%s2760_s4 + $0x568] sm:$0xff] %v1484_v42 }
 0x1d8   : > { %1678 = vst [vmem:[%s2760_s4 + $0x560] sm:$0xff] %v1483_v44  ;;  %v880_v45 = vpop.f32.mrb[116].mxu0  ;;  %v1277_v46 = vpop.f32.mrb[116].mxu1 }
 0x1d9   : > { %v1485_v47 = vmax.f32 %v880_v45, 0.0  ;;  %v1487_v48 = vmax.f32 %v1277_v46, 0.0  ;;  %v882_v49 = vpop.f32.mrb[117].mxu0  ;;  %v2183_v50 = vpop.f32.mrb[117].mxu1 }
 0x1da   : > { %v1486_v51 = vmax.f32 %v882_v49, 0.0 }
 0x1db   : > { %1680 = vst [vmem:[%s2760_s4 + $0x570] sm:$0xff] %v1485_v47  ;;  %1682 = vst [vmem:[%s2760_s4 + $0x580] sm:$0xff] %v1487_v48 }
 0x1dc   : > { %1681 = vst [vmem:[%s2760_s4 + $0x578] sm:$0xff] %v1486_v51  ;;  %v886_v52 = vpop.f32.mrb[118].mxu0  ;;  %v1282_v53 = vpop.f32.mrb[118].mxu1 }
 0x1dd   : > { %v1488_v54 = vmax.f32 %v886_v52, 0.0  ;;  %v1490_v55 = vmax.f32 %v1282_v53, 0.0  ;;  %v888_v56 = vpop.f32.mrb[119].mxu0  ;;  %v2186_v57 = vpop.f32.mrb[119].mxu1 }
 0x1de   : > { %v1489_v58 = vmax.f32 %v888_v56, 0.0 }
 0x1df   : > { %1683 = vst [vmem:[%s2760_s4 + $0x588] sm:$0xff] %v1488_v54  ;;  %1685 = vst [vmem:[%s2760_s4 + $0x598] sm:$0xff] %v1490_v55 }
 0x1e0   : > { %1684 = vst [vmem:[%s2760_s4 + $0x590] sm:$0xff] %v1489_v58  ;;  %v892_v59 = vpop.f32.mrb[120].mxu0  ;;  %v1287_v60 = vpop.f32.mrb[120].mxu1 }
 0x1e1   : > { %v1491_v61 = vmax.f32 %v892_v59, 0.0  ;;  %v1493_v62 = vmax.f32 %v1287_v60, 0.0  ;;  %v894_v63 = vpop.f32.mrb[121].mxu0  ;;  %v2189_v0 = vpop.f32.mrb[121].mxu1 }
 0x1e2   : > { %v1492_v2 = vmax.f32 %v894_v63, 0.0 }
 0x1e3   : > { %1686 = vst [vmem:[%s2760_s4 + $0x5a0] sm:$0xff] %v1491_v61  ;;  %1688 = vst [vmem:[%s2760_s4 + $0x5b0] sm:$0xff] %v1493_v62 }
 0x1e4   : > { %1687 = vst [vmem:[%s2760_s4 + $0x5a8] sm:$0xff] %v1492_v2  ;;  %v898_v3 = vpop.f32.mrb[122].mxu0  ;;  %v1292_v4 = vpop.f32.mrb[122].mxu1 }
 0x1e5   : > { %v1494_v5 = vmax.f32 %v898_v3, 0.0  ;;  %v1496_v6 = vmax.f32 %v1292_v4, 0.0  ;;  %v900_v7 = vpop.f32.mrb[123].mxu0  ;;  %v2192_v8 = vpop.f32.mrb[123].mxu1 }
 0x1e6   : > { %v1495_v9 = vmax.f32 %v900_v7, 0.0 }
 0x1e7   : > { %1689 = vst [vmem:[%s2760_s4 + $0x5b8] sm:$0xff] %v1494_v5  ;;  %1691 = vst [vmem:[%s2760_s4 + $0x5c8] sm:$0xff] %v1496_v6 }
 0x1e8   : > { %1690 = vst [vmem:[%s2760_s4 + $0x5c0] sm:$0xff] %v1495_v9  ;;  %v904_v10 = vpop.f32.mrb[124].mxu0  ;;  %v1297_v11 = vpop.f32.mrb[124].mxu1 }
 0x1e9   : > { %v1497_v12 = vmax.f32 %v904_v10, 0.0  ;;  %v1499_v13 = vmax.f32 %v1297_v11, 0.0  ;;  %v906_v14 = vpop.f32.mrb[125].mxu0  ;;  %v2195_v15 = vpop.f32.mrb[125].mxu1 }
 0x1ea   : > { %v1498_v16 = vmax.f32 %v906_v14, 0.0 }
 0x1eb   : > { %1692 = vst [vmem:[%s2760_s4 + $0x5d0] sm:$0xff] %v1497_v12  ;;  %1694 = vst [vmem:[%s2760_s4 + $0x5e0] sm:$0xff] %v1499_v13 }
 0x1ec   : > { %1693 = vst [vmem:[%s2760_s4 + $0x5d8] sm:$0xff] %v1498_v16  ;;  %v910_v17 = vpop.f32.mrb[126].mxu0  ;;  %v1302_v18 = vpop.f32.mrb[126].mxu1 }
 0x1ed   : > { %v1500_v19 = vmax.f32 %v910_v17, 0.0  ;;  %v1502_v20 = vmax.f32 %v1302_v18, 0.0  ;;  %v912_v21 = vpop.f32.mrb[127].mxu0  ;;  %v2198_v22 = vpop.f32.mrb[127].mxu1 }
 0x1ee   : > { %v1501_v23 = vmax.f32 %v912_v21, 0.0 }
 0x1ef   : > { %1695 = vst [vmem:[%s2760_s4 + $0x5e8] sm:$0xff] %v1500_v19  ;;  %1697 = vst [vmem:[%s2760_s4 + $0x5f8] sm:$0xff] %v1502_v20 }
 0x1f0   : > { %1696 = vst [vmem:[%s2760_s4 + $0x5f0] sm:$0xff] %v1501_v23  ;;  %v916_v24 = vpop.f32.mrb[128].mxu0  ;;  %v1307_v25 = vpop.f32.mrb[128].mxu1 }
 0x1f1   : > { %v1503_v26 = vmax.f32 %v916_v24, 0.0  ;;  %v1505_v27 = vmax.f32 %v1307_v25, 0.0  ;;  %v918_v28 = vpop.f32.mrb[129].mxu0  ;;  %v2201_v29 = vpop.f32.mrb[129].mxu1 }
 0x1f2   : > { %v1504_v30 = vmax.f32 %v918_v28, 0.0 }
 0x1f3   : > { %1698 = vst [vmem:[%s2760_s4 + $0x600] sm:$0x1] %v1503_v26  ;;  %1700 = vst [vmem:[%s2760_s4 + $0x610] sm:$0x1] %v1505_v27 }
 0x1f4   : > { %1699 = vst [vmem:[%s2760_s4 + $0x608] sm:$0x1] %v1504_v30 }
 0x1f5 PF: > { %s12_s11 = sadd.s32 1, %s2271_s11   ;;  %s3061_s9 = smov %s2267_s10 }
 0x1f6   : > { %p9_p5 = scmp.ge.s32.totalorder %s12_s11, 4   ;;  %s3062_s10 = smov %s3064_s12 }
 0x1f8   :  { %11 = sbr.rel (!%p9_p5) target bundleno = 2 (0x2), region = 58 }

</bundles_post_ra>
